<compile_context>
chip_gen: v7x
topology: tpu7x:2x2x1
jax: 0.10.0
libtpu: 0.0.40
codegen_flags: <defaults>
</compile_context>

<pallas_src>
import functools

import jax
import jax.numpy as jnp
from jax.experimental import pallas as pl
from jax.experimental.pallas import tpu as pltpu

# Logical layer sizes of the classifier (PyTorch spec).
DIMS = [784, 500, 250, 128, 100, 64, 10]
# Padded widths: hidden dims rounded to multiples of 128 where possible, and
# the 10-wide logits padded to a lane-dense 128 columns.
PADDED_DIMS = [784, 512, 256, 128, 128, 64, 128]
_NUM_LAYERS = len(DIMS) - 1
# Large finite negative used to pad the final bias so padded logit columns
# never win the row max and exp() underflows to exactly 0 (no -inf/-inf NaN).
_NEG_PAD = -1e30


def _round_up(x, m):
    return (x + m - 1) // m * m


def _mlp_kernel(x_ref,
                w1_ref, b1_ref,
                w2_ref, b2_ref,
                w3_ref, b3_ref,
                w4_ref, b4_ref,
                w5_ref, b5_ref,
                w6_ref, b6_ref,
                out_ref):
    """One batch tile of the forward pass.

    bf16 activations/weights feed the MXU with f32 accumulation; bias add,
    ReLU and log-softmax stay in f32 (v5e VPU/EUP have no bf16).
    """
    h = x_ref[...]                                           # bf16 (TILE_B, 784)

    # Hidden layers: Linear -> ReLU (dropout == identity in eval mode).
    for w_ref, b_ref in ((w1_ref, b1_ref), (w2_ref, b2_ref), (w3_ref, b3_ref),
                         (w4_ref, b4_ref), (w5_ref, b5_ref)):
        acc = jnp.dot(h, w_ref[...], preferred_element_type=jnp.float32)
        acc = acc + b_ref[...]                               # (TILE_B,N)+(1,N)
        acc = jnp.maximum(acc, 0.0)
        h = acc.astype(jnp.bfloat16)                         # bf16 to next MXU

    # Output layer, padded to 128 lane-dense columns.  Padded columns have
    # zero weights and bias -1e30, so they never affect max / sum-exp.
    logits = jnp.dot(h, w6_ref[...], preferred_element_type=jnp.float32)
    logits = logits + b6_ref[...]                            # (TILE_B, 128)

    # Numerically stable LogSoftmax along dim=1 (over all 128 lanes; padded
    # lanes contribute exp(-huge) == 0).
    m = jnp.max(logits, axis=1, keepdims=True)
    shifted = logits - m
    lse = jnp.log(jnp.sum(jnp.exp(shifted), axis=1, keepdims=True))
    out_ref[...] = shifted - lse


def prepare_params(params):
    """One-time bf16 cast + zero-pad of the weights to PADDED_DIMS.

    Call ONCE at model-load time; pass the returned tuple into
    digit_classifier_forward on every call (keeps padding/casting out of the
    per-forward hot path).

    Zero-padded weight columns produce ReLU(0)=0 activations which multiply
    the next layer's zero-padded rows, so results match the unpadded network
    up to bf16 rounding.  The final bias is padded with -1e30 so the padded
    logit columns vanish in the log-softmax.
    """
    flat = []
    for i, (w, b) in enumerate(params):
        in_p, out_p = PADDED_DIMS[i], PADDED_DIMS[i + 1]
        w_p = jnp.pad(jnp.asarray(w, jnp.bfloat16),
                      ((0, in_p - w.shape[0]), (0, out_p - w.shape[1])))
        b2 = jnp.reshape(jnp.asarray(b, jnp.float32), (1, -1))
        pad_n = out_p - b2.shape[-1]
        if i == _NUM_LAYERS - 1:
            b_p = jnp.pad(b2, ((0, 0), (0, pad_n)), constant_values=_NEG_PAD)
        else:
            b_p = jnp.pad(b2, ((0, 0), (0, pad_n)))
        flat.append(w_p)
        flat.append(b_p)
    return tuple(flat)


def _select_tiling(batch, batch_tile):
    """Pick (tile_b, padded_batch).

    * tiny batches: one 16-row tile (bf16 packs 16 rows per sublane group),
    * medium batches (<= 2*batch_tile): exactly two parallel tiles so both
      v7x TensorCores get work,
    * large batches: batch_tile-row tiles.
    """
    if batch <= 32:
        tile_b = max(16, _round_up(batch, 16))
        padded_batch = tile_b
    elif batch <= 2 * batch_tile:
        tile_b = _round_up((batch + 1) // 2, 16)
        padded_batch = _round_up(batch, tile_b)
    else:
        tile_b = batch_tile
        padded_batch = _round_up(batch, tile_b)
    return tile_b, padded_batch


@functools.partial(jax.jit, static_argnums=(2,))
def _forward_impl(x, flat_params, batch_tile):
    x2d = jnp.reshape(x, (-1, DIMS[0]))
    batch = x2d.shape[0]
    x_bf16 = x2d.astype(jnp.bfloat16)          # cast BEFORE pad (fewer bytes)

    tile_b, padded_batch = _select_tiling(batch, batch_tile)
    if padded_batch != batch:
        x_bf16 = jnp.pad(x_bf16, ((0, padded_batch - batch), (0, 0)))

    def resident_spec(shape):
        # Full-array block with a constant block index: DMA'd once, stays
        # VMEM-resident across all batch grid steps.
        return pl.BlockSpec(shape, lambda i: (0, 0))

    in_specs = [pl.BlockSpec((tile_b, PADDED_DIMS[0]), lambda i: (i, 0))]
    in_specs += [resident_spec(p.shape) for p in flat_params]
    out_spec = pl.BlockSpec((tile_b, PADDED_DIMS[-1]), lambda i: (i, 0))

    # Advisory cost estimate so XLA schedules the (tiny) custom call sensibly.
    flops = 2 * padded_batch * sum(
        PADDED_DIMS[i] * PADDED_DIMS[i + 1] for i in range(_NUM_LAYERS))
    weight_bytes = sum(
        PADDED_DIMS[i] * PADDED_DIMS[i + 1] * 2 + PADDED_DIMS[i + 1] * 4
        for i in range(_NUM_LAYERS))
    bytes_accessed = (padded_batch * PADDED_DIMS[0] * 2 + weight_bytes
                      + padded_batch * PADDED_DIMS[-1] * 4)
    cost = pl.CostEstimate(flops=flops,
                           transcendentals=padded_batch * (PADDED_DIMS[-1] + 1),
                           bytes_accessed=bytes_accessed)

    out = pl.pallas_call(
        _mlp_kernel,
        out_shape=jax.ShapeDtypeStruct((padded_batch, PADDED_DIMS[-1]),
                                       jnp.float32),
        grid=(padded_batch // tile_b,),
        in_specs=in_specs,
        out_specs=out_spec,
        compiler_params=pltpu.CompilerParams(
            dimension_semantics=("parallel",),   # batch tiles are independent
            vmem_limit_bytes=16 << 20,           # actual footprint ~5 MiB max
        ),
        cost_estimate=cost,
    )(x_bf16, *flat_params)

    # Drop batch padding and the 118 padded logit columns.
    return out[:batch, :DIMS[-1]]


def digit_classifier_forward(x, padded_params, batch_tile=256):
    """x: any shape that flattens to (-1, 784), e.g. NCHW (B, 1, 28, 28).

    `padded_params` must come from prepare_params(params) (pad/cast is done
    once, outside the per-call path).
    """
    return _forward_impl(x, padded_params, int(batch_tile))


def init_params(key):
    """PyTorch default Linear init: U(-1/sqrt(fan_in), 1/sqrt(fan_in))."""
    params = []
    for i in range(len(DIMS) - 1):
        fan_in, fan_out = DIMS[i], DIMS[i + 1]
        key, kw, kb = jax.random.split(key, 3)
        bound = 1.0 / (fan_in ** 0.5)
        w = jax.random.uniform(kw, (fan_in, fan_out), jnp.float32,
                               minval=-bound, maxval=bound)
        b = jax.random.uniform(kb, (fan_out,), jnp.float32,
                               minval=-bound, maxval=bound)
        params.append((w, b))
    return params


if __name__ == "__main__":
    key = jax.random.PRNGKey(0)
    key, kx = jax.random.split(key)

    # MNIST-like NCHW batch: (B=8, C=1, H=28, W=28) -> flattens to (8, 784).
    x = jax.random.normal(kx, (8, 1, 28, 28), dtype=jnp.float32)
    params = init_params(key)
    padded_params = prepare_params(params)   # one-time pad/cast (hoisted)

    out = digit_classifier_forward(x, padded_params)
    out = jax.block_until_ready(out)

    # Shape + valid log-probabilities.
    assert out.shape == (8, 10)
    row_sums = jnp.sum(jnp.exp(out), axis=1)
    assert bool(jnp.all(jnp.abs(row_sums - 1.0) < 1e-4))

    # Reference mirroring the kernel's bf16-weight / f32-accumulate path.
    def ref_forward_bf16(x, params):
        h = jnp.reshape(x, (-1, DIMS[0])).astype(jnp.bfloat16)
        logits = None
        for i, (w, b) in enumerate(params):
            acc = jnp.dot(h, w.astype(jnp.bfloat16),
                          preferred_element_type=jnp.float32)
            acc = acc + b.astype(jnp.float32)
            if i < len(params) - 1:
                h = jnp.maximum(acc, 0.0).astype(jnp.bfloat16)
            else:
                logits = acc
        return jax.nn.log_softmax(logits, axis=1)

    ref = ref_forward_bf16(x, params)
    assert bool(jnp.max(jnp.abs(out - ref)) < 1e-2)

    # Loose sanity check vs. a pure-f32 reference (bf16 quantization error).
    def ref_forward_f32(x, params):
        h = jnp.reshape(x, (-1, DIMS[0])).astype(jnp.float32)
        for i, (w, b) in enumerate(params):
            h = h @ w + b
            if i < len(params) - 1:
                h = jnp.maximum(h, 0.0)
        return jax.nn.log_softmax(h, axis=1)

    ref32 = ref_forward_f32(x, params)
    assert bool(jnp.max(jnp.abs(out - ref32)) < 0.2)

    print("KERNEL_OK")
</pallas_src>

<mosaic_0001>
module attributes {stable_mosaic.version = 11 : i64} {
  func.func @_mlp_kernel(%arg0: i32, %arg1: memref<16x784xbf16, #tpu.memory_space<vmem>>, %arg2: memref<784x512xbf16, #tpu.memory_space<vmem>>, %arg3: memref<1x512xf32, #tpu.memory_space<vmem>>, %arg4: memref<512x256xbf16, #tpu.memory_space<vmem>>, %arg5: memref<1x256xf32, #tpu.memory_space<vmem>>, %arg6: memref<256x128xbf16, #tpu.memory_space<vmem>>, %arg7: memref<1x128xf32, #tpu.memory_space<vmem>>, %arg8: memref<128x128xbf16, #tpu.memory_space<vmem>>, %arg9: memref<1x128xf32, #tpu.memory_space<vmem>>, %arg10: memref<128x64xbf16, #tpu.memory_space<vmem>>, %arg11: memref<1x64xf32, #tpu.memory_space<vmem>>, %arg12: memref<64x128xbf16, #tpu.memory_space<vmem>>, %arg13: memref<1x128xf32, #tpu.memory_space<vmem>>, %arg14: memref<16x128xf32, #tpu.memory_space<vmem>>) attributes {dimension_semantics = [#tpu.dimension_semantics<parallel>], iteration_bounds = array<i64: 1>, scalar_prefetch = 0 : i64, scratch_operands = 0 : i64, tpu.core_type = #tpu.core_type<tc>, window_params = [{transform_indices = @transform_0, window_bounds = array<i64: 16, 784>}, {pipeline_mode = #tpu.pipeline_mode<synchronous>, transform_indices = @transform_1, window_bounds = array<i64: 784, 512>}, {pipeline_mode = #tpu.pipeline_mode<synchronous>, transform_indices = @transform_2, window_bounds = array<i64: 1, 512>}, {pipeline_mode = #tpu.pipeline_mode<synchronous>, transform_indices = @transform_3, window_bounds = array<i64: 512, 256>}, {pipeline_mode = #tpu.pipeline_mode<synchronous>, transform_indices = @transform_4, window_bounds = array<i64: 1, 256>}, {pipeline_mode = #tpu.pipeline_mode<synchronous>, transform_indices = @transform_5, window_bounds = array<i64: 256, 128>}, {pipeline_mode = #tpu.pipeline_mode<synchronous>, transform_indices = @transform_6, window_bounds = array<i64: 1, 128>}, {pipeline_mode = #tpu.pipeline_mode<synchronous>, transform_indices = @transform_7, window_bounds = array<i64: 128, 128>}, {pipeline_mode = #tpu.pipeline_mode<synchronous>, transform_indices = @transform_8, window_bounds = array<i64: 1, 128>}, {pipeline_mode = #tpu.pipeline_mode<synchronous>, transform_indices = @transform_9, window_bounds = array<i64: 128, 64>}, {pipeline_mode = #tpu.pipeline_mode<synchronous>, transform_indices = @transform_10, window_bounds = array<i64: 1, 64>}, {pipeline_mode = #tpu.pipeline_mode<synchronous>, transform_indices = @transform_11, window_bounds = array<i64: 64, 128>}, {pipeline_mode = #tpu.pipeline_mode<synchronous>, transform_indices = @transform_12, window_bounds = array<i64: 1, 128>}, {transform_indices = @transform_13, window_bounds = array<i64: 16, 128>}]} {
    %c0 = arith.constant 0 : index
    %c0_0 = arith.constant 0 : index
    %0 = vector.load %arg1[%c0, %c0_0] : memref<16x784xbf16, #tpu.memory_space<vmem>>, vector<16x784xbf16>
    %c0_1 = arith.constant 0 : index
    %c0_2 = arith.constant 0 : index
    %1 = vector.load %arg2[%c0_1, %c0_2] : memref<784x512xbf16, #tpu.memory_space<vmem>>, vector<784x512xbf16>
    %cst = arith.constant dense<0.000000e+00> : vector<16x512xf32>
    %2 = tpu.matmul %0, %1, %cst {dimension_numbers = #tpu.dot_dimension_numbers<[1], [0], [0], [1], [0, 0, 1, 1], [], []>} : vector<16x784xbf16>, vector<784x512xbf16>, vector<16x512xf32> -> vector<16x512xf32>
    %c0_3 = arith.constant 0 : index
    %c0_4 = arith.constant 0 : index
    %3 = vector.load %arg3[%c0_3, %c0_4] : memref<1x512xf32, #tpu.memory_space<vmem>>, vector<1x512xf32>
    %4 = vector.broadcast %3 : vector<1x512xf32> to vector<16x512xf32>
    %5 = arith.addf %2, %4 : vector<16x512xf32>
    %cst_5 = arith.constant 0.000000e+00 : f32
    %6 = vector.broadcast %cst_5 : f32 to vector<16x512xf32>
    %7 = arith.maximumf %5, %6 : vector<16x512xf32>
    %8 = arith.truncf %7 : vector<16x512xf32> to vector<16x512xbf16>
    %c0_6 = arith.constant 0 : index
    %c0_7 = arith.constant 0 : index
    %9 = vector.load %arg4[%c0_6, %c0_7] : memref<512x256xbf16, #tpu.memory_space<vmem>>, vector<512x256xbf16>
    %cst_8 = arith.constant dense<0.000000e+00> : vector<16x256xf32>
    %10 = tpu.matmul %8, %9, %cst_8 {dimension_numbers = #tpu.dot_dimension_numbers<[1], [0], [0], [1], [0, 0, 1, 1], [], []>} : vector<16x512xbf16>, vector<512x256xbf16>, vector<16x256xf32> -> vector<16x256xf32>
    %c0_9 = arith.constant 0 : index
    %c0_10 = arith.constant 0 : index
    %11 = vector.load %arg5[%c0_9, %c0_10] : memref<1x256xf32, #tpu.memory_space<vmem>>, vector<1x256xf32>
    %12 = vector.broadcast %11 : vector<1x256xf32> to vector<16x256xf32>
    %13 = arith.addf %10, %12 : vector<16x256xf32>
    %cst_11 = arith.constant 0.000000e+00 : f32
    %14 = vector.broadcast %cst_11 : f32 to vector<16x256xf32>
    %15 = arith.maximumf %13, %14 : vector<16x256xf32>
    %16 = arith.truncf %15 : vector<16x256xf32> to vector<16x256xbf16>
    %c0_12 = arith.constant 0 : index
    %c0_13 = arith.constant 0 : index
    %17 = vector.load %arg6[%c0_12, %c0_13] : memref<256x128xbf16, #tpu.memory_space<vmem>>, vector<256x128xbf16>
    %cst_14 = arith.constant dense<0.000000e+00> : vector<16x128xf32>
    %18 = tpu.matmul %16, %17, %cst_14 {dimension_numbers = #tpu.dot_dimension_numbers<[1], [0], [0], [1], [0, 0, 1, 1], [], []>} : vector<16x256xbf16>, vector<256x128xbf16>, vector<16x128xf32> -> vector<16x128xf32>
    %c0_15 = arith.constant 0 : index
    %c0_16 = arith.constant 0 : index
    %19 = vector.load %arg7[%c0_15, %c0_16] : memref<1x128xf32, #tpu.memory_space<vmem>>, vector<1x128xf32>
    %20 = vector.broadcast %19 : vector<1x128xf32> to vector<16x128xf32>
    %21 = arith.addf %18, %20 : vector<16x128xf32>
    %cst_17 = arith.constant 0.000000e+00 : f32
    %22 = vector.broadcast %cst_17 : f32 to vector<16x128xf32>
    %23 = arith.maximumf %21, %22 : vector<16x128xf32>
    %24 = arith.truncf %23 : vector<16x128xf32> to vector<16x128xbf16>
    %c0_18 = arith.constant 0 : index
    %c0_19 = arith.constant 0 : index
    %25 = vector.load %arg8[%c0_18, %c0_19] : memref<128x128xbf16, #tpu.memory_space<vmem>>, vector<128x128xbf16>
    %cst_20 = arith.constant dense<0.000000e+00> : vector<16x128xf32>
    %26 = tpu.matmul %24, %25, %cst_20 {dimension_numbers = #tpu.dot_dimension_numbers<[1], [0], [0], [1], [0, 0, 1, 1], [], []>} : vector<16x128xbf16>, vector<128x128xbf16>, vector<16x128xf32> -> vector<16x128xf32>
    %c0_21 = arith.constant 0 : index
    %c0_22 = arith.constant 0 : index
    %27 = vector.load %arg9[%c0_21, %c0_22] : memref<1x128xf32, #tpu.memory_space<vmem>>, vector<1x128xf32>
    %28 = vector.broadcast %27 : vector<1x128xf32> to vector<16x128xf32>
    %29 = arith.addf %26, %28 : vector<16x128xf32>
    %cst_23 = arith.constant 0.000000e+00 : f32
    %30 = vector.broadcast %cst_23 : f32 to vector<16x128xf32>
    %31 = arith.maximumf %29, %30 : vector<16x128xf32>
    %32 = arith.truncf %31 : vector<16x128xf32> to vector<16x128xbf16>
    %c0_24 = arith.constant 0 : index
    %c0_25 = arith.constant 0 : index
    %33 = vector.load %arg10[%c0_24, %c0_25] : memref<128x64xbf16, #tpu.memory_space<vmem>>, vector<128x64xbf16>
    %cst_26 = arith.constant dense<0.000000e+00> : vector<16x64xf32>
    %34 = tpu.matmul %32, %33, %cst_26 {dimension_numbers = #tpu.dot_dimension_numbers<[1], [0], [0], [1], [0, 0, 1, 1], [], []>} : vector<16x128xbf16>, vector<128x64xbf16>, vector<16x64xf32> -> vector<16x64xf32>
    %c0_27 = arith.constant 0 : index
    %c0_28 = arith.constant 0 : index
    %35 = vector.load %arg11[%c0_27, %c0_28] : memref<1x64xf32, #tpu.memory_space<vmem>>, vector<1x64xf32>
    %36 = vector.broadcast %35 : vector<1x64xf32> to vector<16x64xf32>
    %37 = arith.addf %34, %36 : vector<16x64xf32>
    %cst_29 = arith.constant 0.000000e+00 : f32
    %38 = vector.broadcast %cst_29 : f32 to vector<16x64xf32>
    %39 = arith.maximumf %37, %38 : vector<16x64xf32>
    %40 = arith.truncf %39 : vector<16x64xf32> to vector<16x64xbf16>
    %c0_30 = arith.constant 0 : index
    %c0_31 = arith.constant 0 : index
    %41 = vector.load %arg12[%c0_30, %c0_31] : memref<64x128xbf16, #tpu.memory_space<vmem>>, vector<64x128xbf16>
    %cst_32 = arith.constant dense<0.000000e+00> : vector<16x128xf32>
    %42 = tpu.matmul %40, %41, %cst_32 {dimension_numbers = #tpu.dot_dimension_numbers<[1], [0], [0], [1], [0, 0, 1, 1], [], []>} : vector<16x64xbf16>, vector<64x128xbf16>, vector<16x128xf32> -> vector<16x128xf32>
    %c0_33 = arith.constant 0 : index
    %c0_34 = arith.constant 0 : index
    %43 = vector.load %arg13[%c0_33, %c0_34] : memref<1x128xf32, #tpu.memory_space<vmem>>, vector<1x128xf32>
    %44 = vector.broadcast %43 : vector<1x128xf32> to vector<16x128xf32>
    %45 = arith.addf %42, %44 : vector<16x128xf32>
    %cst_35 = arith.constant dense<0xFF800000> : vector<16xf32>
    %46 = vector.multi_reduction <maximumf>, %45, %cst_35 [1] : vector<16x128xf32> to vector<16xf32>
    %47 = vector.shape_cast %46 : vector<16xf32> to vector<16x1xf32>
    %48 = vector.broadcast %47 : vector<16x1xf32> to vector<16x128xf32>
    %49 = arith.subf %45, %48 : vector<16x128xf32>
    %50 = math.exp %49 : vector<16x128xf32>
    %cst_36 = arith.constant dense<0.000000e+00> : vector<16xf32>
    %51 = vector.multi_reduction <add>, %50, %cst_36 [1] : vector<16x128xf32> to vector<16xf32>
    %52 = vector.shape_cast %51 : vector<16xf32> to vector<16x1xf32>
    %53 = math.log %52 : vector<16x1xf32>
    %54 = vector.broadcast %53 : vector<16x1xf32> to vector<16x128xf32>
    %55 = arith.subf %49, %54 : vector<16x128xf32>
    %c0_37 = arith.constant 0 : index
    %c0_38 = arith.constant 0 : index
    %56 = vector.load %arg14[%c0_37, %c0_38] : memref<16x128xf32, #tpu.memory_space<vmem>>, vector<16x128xf32>
    tpu.vector_store %arg14[%c0_37, %c0_38], %55 {strides = array<i32>} : memref<16x128xf32, #tpu.memory_space<vmem>>, vector<16x128xf32>,
    return
  }
  func.func @transform_0(%arg0: i32) -> (i32, i32) {
    %c0_i32 = arith.constant 0 : i32
    %c0_i32_0 = arith.constant 0 : i32
    return %arg0, %c0_i32 : i32, i32
  }
  func.func @transform_1(%arg0: i32) -> (i32, i32) {
    %c0_i32 = arith.constant 0 : i32
    %c0_i32_0 = arith.constant 0 : i32
    %c0_i32_1 = arith.constant 0 : i32
    return %c0_i32, %c0_i32_0 : i32, i32
  }
  func.func @transform_2(%arg0: i32) -> (i32, i32) {
    %c0_i32 = arith.constant 0 : i32
    %c0_i32_0 = arith.constant 0 : i32
    %c0_i32_1 = arith.constant 0 : i32
    return %c0_i32, %c0_i32_0 : i32, i32
  }
  func.func @transform_3(%arg0: i32) -> (i32, i32) {
    %c0_i32 = arith.constant 0 : i32
    %c0_i32_0 = arith.constant 0 : i32
    %c0_i32_1 = arith.constant 0 : i32
    return %c0_i32, %c0_i32_0 : i32, i32
  }
  func.func @transform_4(%arg0: i32) -> (i32, i32) {
    %c0_i32 = arith.constant 0 : i32
    %c0_i32_0 = arith.constant 0 : i32
    %c0_i32_1 = arith.constant 0 : i32
    return %c0_i32, %c0_i32_0 : i32, i32
  }
  func.func @transform_5(%arg0: i32) -> (i32, i32) {
    %c0_i32 = arith.constant 0 : i32
    %c0_i32_0 = arith.constant 0 : i32
    %c0_i32_1 = arith.constant 0 : i32
    return %c0_i32, %c0_i32_0 : i32, i32
  }
  func.func @transform_6(%arg0: i32) -> (i32, i32) {
    %c0_i32 = arith.constant 0 : i32
    %c0_i32_0 = arith.constant 0 : i32
    %c0_i32_1 = arith.constant 0 : i32
    return %c0_i32, %c0_i32_0 : i32, i32
  }
  func.func @transform_7(%arg0: i32) -> (i32, i32) {
    %c0_i32 = arith.constant 0 : i32
    %c0_i32_0 = arith.constant 0 : i32
    %c0_i32_1 = arith.constant 0 : i32
    return %c0_i32, %c0_i32_0 : i32, i32
  }
  func.func @transform_8(%arg0: i32) -> (i32, i32) {
    %c0_i32 = arith.constant 0 : i32
    %c0_i32_0 = arith.constant 0 : i32
    %c0_i32_1 = arith.constant 0 : i32
    return %c0_i32, %c0_i32_0 : i32, i32
  }
  func.func @transform_9(%arg0: i32) -> (i32, i32) {
    %c0_i32 = arith.constant 0 : i32
    %c0_i32_0 = arith.constant 0 : i32
    %c0_i32_1 = arith.constant 0 : i32
    return %c0_i32, %c0_i32_0 : i32, i32
  }
  func.func @transform_10(%arg0: i32) -> (i32, i32) {
    %c0_i32 = arith.constant 0 : i32
    %c0_i32_0 = arith.constant 0 : i32
    %c0_i32_1 = arith.constant 0 : i32
    return %c0_i32, %c0_i32_0 : i32, i32
  }
  func.func @transform_11(%arg0: i32) -> (i32, i32) {
    %c0_i32 = arith.constant 0 : i32
    %c0_i32_0 = arith.constant 0 : i32
    %c0_i32_1 = arith.constant 0 : i32
    return %c0_i32, %c0_i32_0 : i32, i32
  }
  func.func @transform_12(%arg0: i32) -> (i32, i32) {
    %c0_i32 = arith.constant 0 : i32
    %c0_i32_0 = arith.constant 0 : i32
    %c0_i32_1 = arith.constant 0 : i32
    return %c0_i32, %c0_i32_0 : i32, i32
  }
  func.func @transform_13(%arg0: i32) -> (i32, i32) {
    %c0_i32 = arith.constant 0 : i32
    %c0_i32_0 = arith.constant 0 : i32
    return %arg0, %c0_i32 : i32, i32
  }
}

</mosaic_0001>

<bundles_post_ra>
// kernel: _forward_impl.1
= control target key start
LH: loop header
LB: loop body
LE: loop exit
PB: predicated region body
PF: predicated region fallthrough
CT: control target
= control target key end

     0   :  { %18 = vsyncpa [#allocation3], 0  ;;  %s4233_s0 = inlined_call_operand.vmem [shape: bf16[16,784], index: 0, kind: input, shape index: {}]   ;;  %s4234_s1 = inlined_call_operand.hbm [shape: bf16[784,512], index: 1, kind: input, shape index: {}]   ;;  %s4235_s2 = inlined_call_operand.vmem [shape: f32[1,512], index: 2, kind: input, shape index: {}]   ;;  %s4236_s3 = inlined_call_operand.vmem [shape: bf16[512,256], index: 3, kind: input, shape index: {}]   ;;  %s4237_s4 = inlined_call_operand.vmem [shape: f32[1,256], index: 4, kind: input, shape index: {}]   ;;  %s4238_s5 = inlined_call_operand.vmem [shape: bf16[256,128], index: 5, kind: input, shape index: {}]   ;;  %s4239_s6 = inlined_call_operand.vmem [shape: f32[1,128], index: 6, kind: input, shape index: {}]   ;;  %s4240_s7 = inlined_call_operand.vmem [shape: bf16[128,128], index: 7, kind: input, shape index: {}]   ;;  %s4241_s8 = inlined_call_operand.hbm [shape: f32[1,128], index: 8, kind: input, shape index: {}]   ;;  %s4242_s9 = inlined_call_operand.vmem [shape: bf16[128,64], index: 9, kind: input, shape index: {}]   ;;  %s4243_s10 = inlined_call_operand.hbm [shape: f32[1,64], index: 10, kind: input, shape index: {}]   ;;  %s4244_s11 = inlined_call_operand.hbm [shape: bf16[64,128], index: 11, kind: input, shape index: {}]   ;;  %s4245_s12 = inlined_call_operand.vmem [shape: f32[1,128], index: 12, kind: input, shape index: {}]   ;;  %s4246_s13 = inlined_call_operand.vmem [shape: f32[16,128], index: 13, kind: output, shape index: {}]  }
   0x1   :  { %19 = vsyncpa [#allocation5], 0 }
   0x2   :  { %20 = vsyncpa [#allocation8], 0  ;;  %s3704_s25 = smov [#allocation4]   ;;  %s3705_s27 = smov [#allocation2]  }
   0x3   :  { %s53_s26 = sshll.u32 %s3704_s25, 4  ;;  %s28_s28 = sshll.u32 %s3705_s27, 4  ;;  %s54_s26 = int_to_ptr.vmem [resolvable:$true] %s53_s26  ;;  %s3785_s28 = int_to_ptr.vmem [resolvable:$true] %s28_s28 }
   0x4   :  { %s3610_s14 = scalar_lea.hbm %s4241_s8, 16 }
   0x5   :  { %p3611_p0 = scmp.ne.s32.totalorder %s4241_s8, %s3610_s14  ;;  %p3614_p1 = scmp.lt.u32.totalorder %s3610_s14, %s4241_s8 }
   0x7   :  { %p3616_p2 = pnand %p3614_p1, %p3611_p0 }
   0x9   :  { %3619 = shalt.err (!%p3616_p2)
}
   0xa   :  { %s3620_s19 = scalar_lea.vmem %s54_s26, 16  ;;  %s3624_s20 = scalar_lea.vmem %s54_s26, 32 }
   0xb   :  { %p3621_p3 = scmp.ne.s32.totalorder %s54_s26, %s3620_s19  ;;  %p3625_p4 = scmp.lt.s32.totalorder %s54_s26, %s54_s26 }
   0xc   :  { %p3626_p5 = scmp.lt.s32.totalorder %s3624_s20, %s3620_s19 }
   0xe   :  { %p3627_p6 = por %p3626_p5, %p3625_p4 }
  0x10   :  { %p3628_p7 = pnand %p3627_p6, %p3621_p3 }
  0x12   :  { %3631 = shalt.err (!%p3628_p7)
}
  0x13   :  { %56 = dma.hbm_to_vmem [thread:$0]  %s4241_s8, 16, %s54_s26, [#allocation5]  }
  0x14   :  { %s3632_s25 = scalar_lea.hbm %s4234_s1, 25088 }
  0x15   :  { %p3633_p8 = scmp.ne.s32.totalorder %s4234_s1, %s3632_s25  ;;  %p3636_p9 = scmp.lt.u32.totalorder %s3632_s25, %s4234_s1 }
  0x17   :  { %p3638_p10 = pnand %p3636_p9, %p3633_p8 }
  0x19   :  { %3641 = shalt.err (!%p3638_p10)
}
  0x1a   :  { %s3642_s15 = scalar_lea.vmem %s3785_s28, 25088  ;;  %p3647_p12 = scmp.lt.s32.totalorder %s3785_s28, %s3785_s28 }
  0x1b   :  { %p3643_p11 = scmp.ne.s32.totalorder %s3785_s28, %s3642_s15  ;;  %p3648_p13 = scmp.lt.s32.totalorder %s3642_s15, %s3642_s15 }
  0x1d   :  { %p3649_p0 = por %p3648_p13, %p3647_p12 }
  0x1f   :  { %p3650_p1 = pnand %p3649_p0, %p3643_p11 }
  0x21   :  { %3653 = shalt.err (!%p3650_p1)
}
  0x22   :  { %s3706_s8 = smov 256   ;;  %s3707_s26 = smov 16  }
  0x23   :  { %34 = dma.hbm_to_vmem [thread:$0]  %s4234_s1, 25088, %s3785_s28, [#allocation3], %s3706_s8, %s3706_s8, %s3707_s26  }
  0x24   :  { %s3708_s18 = smov [#allocation6]   ;;  %s3709_s20 = smov [#allocation7]  }
  0x25   :  { %s65_s19 = sshll.u32 %s3708_s18, 4  ;;  %s74_s21 = sshll.u32 %s3709_s20, 4  ;;  %s66_s19 = int_to_ptr.vmem [resolvable:$true] %s65_s19  ;;  %s3816_s21 = int_to_ptr.vmem [resolvable:$true] %s74_s21 }
  0x26   :  { %s3654_s24 = scalar_lea.hbm %s4243_s10, 16 }
  0x27   :  { %p3655_p2 = scmp.ne.s32.totalorder %s4243_s10, %s3654_s24  ;;  %p3658_p3 = scmp.lt.u32.totalorder %s3654_s24, %s4243_s10 }
  0x29   :  { %p3660_p4 = pnand %p3658_p3, %p3655_p2 }
  0x2b   :  { %3663 = shalt.err (!%p3660_p4)
}
  0x2c   :  { %s3664_s1 = scalar_lea.vmem %s66_s19, 16  ;;  %s3668_s28 = scalar_lea.vmem %s66_s19, 32 }
  0x2d   :  { %p3665_p5 = scmp.ne.s32.totalorder %s66_s19, %s3664_s1  ;;  %p3669_p6 = scmp.lt.s32.totalorder %s66_s19, %s66_s19 }
  0x2e   :  { %p3670_p7 = scmp.lt.s32.totalorder %s3668_s28, %s3664_s1 }
  0x30   :  { %p3671_p8 = por %p3670_p7, %p3669_p6 }
  0x32   :  { %p3672_p9 = pnand %p3671_p8, %p3665_p5 }
  0x34   :  { %3675 = shalt.err (!%p3672_p9)
}
  0x35   :  { %68 = dma.hbm_to_vmem [thread:$0]  %s4243_s10, 16, %s66_s19, [#allocation5]  }
  0x36   :  { %s3676_s16 = scalar_lea.hbm %s4244_s11, 512 }
  0x37   :  { %p3677_p10 = scmp.ne.s32.totalorder %s4244_s11, %s3676_s16  ;;  %p3680_p11 = scmp.lt.u32.totalorder %s3676_s16, %s4244_s11 }
  0x39   :  { %p3682_p12 = pnand %p3680_p11, %p3677_p10 }
  0x3b   :  { %3685 = shalt.err (!%p3682_p12)
}
  0x3c   :  { %s3686_s23 = scalar_lea.vmem %s3816_s21, 512  ;;  %p3691_p0 = scmp.lt.s32.totalorder %s3816_s21, %s3816_s21 }
  0x3d   :  { %p3687_p13 = scmp.ne.s32.totalorder %s3816_s21, %s3686_s23  ;;  %p3692_p1 = scmp.lt.s32.totalorder %s3686_s23, %s3686_s23 }
  0x3f   :  { %p3693_p2 = por %p3692_p1, %p3691_p0 }
  0x41   :  { %p3694_p3 = pnand %p3693_p2, %p3687_p13 }
  0x43   :  { %3697 = shalt.err (!%p3694_p3)
}
  0x44   :  { %s3710_s10 = smov 64   ;;  %s3711_s19 = smov 4  }
  0x45   :  { %80 = dma.hbm_to_vmem [thread:$0]  %s4244_s11, 512, %s3816_s21, [#allocation8], %s3710_s10, %s3710_s10, %s3711_s19  }
  0x46   :  { %3698 = dma.done.wait [#allocation3], 25088  }
  0x47   :  { %3699 = vsyncadd [#allocation3], 4294942208 }
  0x48   :  { %3700 = dma.done.wait [#allocation5], 32  }
  0x49   :  { %3701 = vsyncadd [#allocation5], 4294967264 }
  0x4a   :  { %3702 = dma.done.wait [#allocation8], 512  }
  0x4b   :  { %3703 = vsyncadd [#allocation8], 4294966784  ;;  %v3712_v0 = vmov 0   ;;  %v3165_v1 = vld [vmem:[#allocation2 + $0x4] ss:$16 sps:$4 sm:$0xff]   ;;  %vm1337_vm0 = vcmask 130048  }
  0x4c   :  { %1502 = vmatprep.mubr.bf16.mxu1 %v3712_v0  ;;  %v3167_v2 = vld [vmem:[#allocation2 + $0x604] ss:$16 sps:$4 sm:$0xff]   ;;  %1341 = vmatprep.subr.bf16.mxu0 %v3165_v1  ;;  %v3169_v3 = vld [vmem:[#allocation2] ss:$16 sps:$4 sm:$0xff]   ;;  %v3173_v6 = vld [vmem:[#allocation2 + $0x8] ss:$16 sps:$4 sm:$0xff]  }
  0x4d   :  { %v3170_v4 = vld [vmem:[#allocation2 + $0x600] ss:$16 sps:$4 sm:$0xff]   ;;  %1470 = vmatprep.subr.bf16.mxu1 %v3167_v2  ;;  %v3171_v5 = vld [vmem:[#allocation2 + $0x24] ss:$16 sps:$4 sm:$0xff]   ;;  %1342 = vmatpush1.bf16.msra.mxu0 %v3169_v3  ;;  %v3175_v7 = vld [vmem:[#allocation2 + $0xc] ss:$16 sps:$4 sm:$0xff]  }
  0x4e   :  { %1471 = vmatpush1.bf16.msra.mxu1 %v3170_v4  ;;  %1343 = vmatprep.subr.bf16.mxu0 %v3171_v5  ;;  %v3176_v8 = vld [vmem:[#allocation2 + $0x20] ss:$16 sps:$4 sm:$0xff]   ;;  %v3177_v9 = vld [vmem:[%s4233_s0 + $0x18] ss:$28 sps:$4 sm:$0xff]   ;;  %v3182_v12 = vld [vmem:[#allocation2 + $0x2c] ss:$16 sps:$4 sm:$0xff]  }
  0x4f   :  { %1513 = vmatprep.subr.bf16.mxu1 %v3175_v7  ;;  %v3178_v10 = vld [vmem:[#allocation2 + $0x44] ss:$16 sps:$4 sm:$0xff]   ;;  %v3180_v11 = vld [vmem:[#allocation2 + $0x28] ss:$16 sps:$4 sm:$0xff]   ;;  %v3183_v13 = vld [vmem:[#allocation2 + $0x40] ss:$16 sps:$4 sm:$0xff]  }
  0x50   :  { %v3184_v14 = vld [vmem:[#allocation2 + $0x64] ss:$16 sps:$4 sm:$0xff]   ;;  %v3188_v15 = vld [vmem:[#allocation2 + $0x4c] ss:$16 sps:$4 sm:$0xff]   ;;  %v3189_v16 = vld [vmem:[#allocation2 + $0x60] ss:$16 sps:$4 sm:$0xff]  }
  0x51   :  { %1344 = vmatpush1.bf16.msra.mxu0 %v3176_v8  ;;  %2910 = vmatmul.mubr.msk.bf16.vlgmr.msra.gmra.mrb[0].mxu1 %vm1337_vm0, %v3177_v9  ;;  %v3186_v17 = vld [vmem:[#allocation2 + $0x48] ss:$16 sps:$4 sm:$0xff]   ;;  %v3190_v18 = vld [vmem:[#allocation2 + $0x84] ss:$16 sps:$4 sm:$0xff]   ;;  %v3194_v19 = vld [vmem:[#allocation2 + $0x6c] ss:$16 sps:$4 sm:$0xff]  }
  0x52   :  { %1514 = vmatpush1.bf16.msra.mxu1 %v3173_v6  ;;  %1345 = vmatprep.subr.bf16.mxu0 %v3178_v10  ;;  %v3192_v20 = vld [vmem:[#allocation2 + $0x68] ss:$16 sps:$4 sm:$0xff]   ;;  %v3195_v21 = vld [vmem:[#allocation2 + $0x80] ss:$16 sps:$4 sm:$0xff]   ;;  %v3196_v22 = vld [vmem:[#allocation2 + $0xa4] ss:$16 sps:$4 sm:$0xff]  }
  0x53   :  { %1515 = vmatprep.subr.bf16.mxu1 %v3182_v12  ;;  %v3200_v23 = vld [vmem:[#allocation2 + $0x8c] ss:$16 sps:$4 sm:$0xff]   ;;  %v3201_v24 = vld [vmem:[#allocation2 + $0xa0] ss:$16 sps:$4 sm:$0xff]   ;;  %v3198_v25 = vld [vmem:[#allocation2 + $0x88] ss:$16 sps:$4 sm:$0xff]  }
  0x54   :  { %v3202_v26 = vld [vmem:[#allocation2 + $0xc4] ss:$16 sps:$4 sm:$0xff]   ;;  %v3206_v27 = vld [vmem:[#allocation2 + $0xac] ss:$16 sps:$4 sm:$0xff]   ;;  %v3204_v28 = vld [vmem:[#allocation2 + $0xa8] ss:$16 sps:$4 sm:$0xff]  }
  0x55   :  { %1346 = vmatpush1.bf16.msra.mxu0 %v3183_v13  ;;  %v3207_v29 = vld [vmem:[#allocation2 + $0xc0] ss:$16 sps:$4 sm:$0xff]   ;;  %v3208_v30 = vld [vmem:[#allocation2 + $0xe4] ss:$16 sps:$4 sm:$0xff]   ;;  %v3212_v31 = vld [vmem:[#allocation2 + $0xcc] ss:$16 sps:$4 sm:$0xff]  }
  0x56   :  { %1516 = vmatpush1.bf16.msra.mxu1 %v3180_v11  ;;  %1347 = vmatprep.subr.bf16.mxu0 %v3184_v14  ;;  %v3213_v32 = vld [vmem:[#allocation2 + $0xe0] ss:$16 sps:$4 sm:$0xff]   ;;  %v3210_v33 = vld [vmem:[#allocation2 + $0xc8] ss:$16 sps:$4 sm:$0xff]   ;;  %v3214_v34 = vld [vmem:[#allocation2 + $0x104] ss:$16 sps:$4 sm:$0xff]  }
  0x57   :  { %1517 = vmatprep.subr.bf16.mxu1 %v3188_v15  ;;  %v3218_v35 = vld [vmem:[#allocation2 + $0xec] ss:$16 sps:$4 sm:$0xff]   ;;  %v3216_v36 = vld [vmem:[#allocation2 + $0xe8] ss:$16 sps:$4 sm:$0xff]   ;;  %v3219_v37 = vld [vmem:[#allocation2 + $0x100] ss:$16 sps:$4 sm:$0xff]  }
  0x58   :  { %v3220_v38 = vld [vmem:[#allocation2 + $0x124] ss:$16 sps:$4 sm:$0xff]   ;;  %v3224_v39 = vld [vmem:[#allocation2 + $0x10c] ss:$16 sps:$4 sm:$0xff]   ;;  %v3225_v40 = vld [vmem:[#allocation2 + $0x120] ss:$16 sps:$4 sm:$0xff]  }
  0x59   :  { %1348 = vmatpush1.bf16.msra.mxu0 %v3189_v16  ;;  %v3222_v41 = vld [vmem:[#allocation2 + $0x108] ss:$16 sps:$4 sm:$0xff]   ;;  %v3226_v42 = vld [vmem:[#allocation2 + $0x144] ss:$16 sps:$4 sm:$0xff]   ;;  %v3230_v43 = vld [vmem:[#allocation2 + $0x12c] ss:$16 sps:$4 sm:$0xff]  }
  0x5a   :  { %1518 = vmatpush1.bf16.msra.mxu1 %v3186_v17  ;;  %1349 = vmatprep.subr.bf16.mxu0 %v3190_v18  ;;  %v3228_v44 = vld [vmem:[#allocation2 + $0x128] ss:$16 sps:$4 sm:$0xff]   ;;  %v3231_v45 = vld [vmem:[#allocation2 + $0x140] ss:$16 sps:$4 sm:$0xff]   ;;  %v3232_v46 = vld [vmem:[#allocation2 + $0x164] ss:$16 sps:$4 sm:$0xff]  }
  0x5b   :  { %1519 = vmatprep.subr.bf16.mxu1 %v3194_v19  ;;  %v3236_v47 = vld [vmem:[#allocation2 + $0x14c] ss:$16 sps:$4 sm:$0xff]   ;;  %v3234_v48 = vld [vmem:[#allocation2 + $0x148] ss:$16 sps:$4 sm:$0xff]   ;;  %v3237_v49 = vld [vmem:[#allocation2 + $0x160] ss:$16 sps:$4 sm:$0xff]  }
  0x5c   :  { %v3264_v50 = vld [vmem:[%s4233_s0 + $0x4] ss:$28 sps:$4 sm:$0xff]   ;;  %v3242_v52 = vld [vmem:[#allocation2 + $0x16c] ss:$16 sps:$4 sm:$0xff]   ;;  %v3240_v53 = vld [vmem:[#allocation2 + $0x168] ss:$16 sps:$4 sm:$0xff]  }
  0x5d   :  { %1350 = vmatpush1.bf16.msra.mxu0 %v3195_v21  ;;  %v3238_v51 = vld [vmem:[#allocation2 + $0x184] ss:$16 sps:$4 sm:$0xff]   ;;  %1373 = vmatprep.mubr.bf16.mxu0 %v3264_v50  ;;  %v3243_v54 = vld [vmem:[#allocation2 + $0x180] ss:$16 sps:$4 sm:$0xff]   ;;  %v3248_v56 = vld [vmem:[#allocation2 + $0x18c] ss:$16 sps:$4 sm:$0xff]  }
  0x5e   :  { %1520 = vmatpush1.bf16.msra.mxu1 %v3192_v20  ;;  %1351 = vmatprep.subr.bf16.mxu0 %v3196_v22  ;;  %v3244_v55 = vld [vmem:[#allocation2 + $0x1a4] ss:$16 sps:$4 sm:$0xff]   ;;  %v3246_v57 = vld [vmem:[#allocation2 + $0x188] ss:$16 sps:$4 sm:$0xff]   ;;  %v3249_v58 = vld [vmem:[#allocation2 + $0x1a0] ss:$16 sps:$4 sm:$0xff]  }
  0x5f   :  { %1521 = vmatprep.subr.bf16.mxu1 %v3200_v23  ;;  %1545 = vmatprep.mubr.bf16.mxu1 %v3264_v50  ;;  %v3250_v59 = vld [vmem:[#allocation2 + $0x1c4] ss:$16 sps:$4 sm:$0xff]   ;;  %v3254_v60 = vld [vmem:[#allocation2 + $0x1ac] ss:$16 sps:$4 sm:$0xff]   ;;  %v3252_v61 = vld [vmem:[#allocation2 + $0x1a8] ss:$16 sps:$4 sm:$0xff]  }
  0x60   :  { %v3255_v62 = vld [vmem:[#allocation2 + $0x1c0] ss:$16 sps:$4 sm:$0xff]   ;;  %v3256_v63 = vld [vmem:[#allocation2 + $0x1e4] ss:$16 sps:$4 sm:$0xff]   ;;  %v3260_v1 = vld [vmem:[#allocation2 + $0x1cc] ss:$16 sps:$4 sm:$0xff]  }
  0x61   :  { %1352 = vmatpush1.bf16.msra.mxu0 %v3201_v24  ;;  %v3258_v2 = vld [vmem:[#allocation2 + $0x1c8] ss:$16 sps:$4 sm:$0xff]   ;;  %v3261_v3 = vld [vmem:[#allocation2 + $0x1e0] ss:$16 sps:$4 sm:$0xff]   ;;  %v3267_v4 = vld [vmem:[#allocation2 + $0x204] ss:$16 sps:$4 sm:$0xff]  }
  0x62   :  { %1522 = vmatpush1.bf16.msra.mxu1 %v3198_v25  ;;  %1353 = vmatprep.subr.bf16.mxu0 %v3202_v26  ;;  %v3270_v5 = vld [vmem:[#allocation2 + $0x1ec] ss:$16 sps:$4 sm:$0xff]   ;;  %v3265_v7 = vld [vmem:[#allocation2 + $0x200] ss:$16 sps:$4 sm:$0xff]   ;;  %v3268_v8 = vld [vmem:[#allocation2 + $0x1e8] ss:$16 sps:$4 sm:$0xff]  }
  0x63   :  { %1523 = vmatprep.subr.bf16.mxu1 %v3206_v27  ;;  %v3262_v6 = vld [vmem:[%s4233_s0] ss:$28 sps:$4 sm:$0xff]   ;;  %v3273_v9 = vld [vmem:[#allocation2 + $0x224] ss:$16 sps:$4 sm:$0xff]   ;;  %v3274_v12 = vld [vmem:[#allocation2 + $0x208] ss:$16 sps:$4 sm:$0xff]  }
  0x64   :  { %v3276_v10 = vld [vmem:[#allocation2 + $0x20c] ss:$16 sps:$4 sm:$0xff]   ;;  %v3271_v11 = vld [vmem:[#allocation2 + $0x220] ss:$16 sps:$4 sm:$0xff]   ;;  %v3279_v13 = vld [vmem:[#allocation2 + $0x244] ss:$16 sps:$4 sm:$0xff]  }
  0x65   :  { %1354 = vmatpush1.bf16.msra.mxu0 %v3207_v29  ;;  %v3282_v14 = vld [vmem:[#allocation2 + $0x22c] ss:$16 sps:$4 sm:$0xff]   ;;  %v3277_v15 = vld [vmem:[#allocation2 + $0x240] ss:$16 sps:$4 sm:$0xff]   ;;  %v3280_v16 = vld [vmem:[#allocation2 + $0x228] ss:$16 sps:$4 sm:$0xff]  }
  0x66   :  { %1524 = vmatpush1.bf16.msra.mxu1 %v3204_v28  ;;  %1355 = vmatprep.subr.bf16.mxu0 %v3208_v30  ;;  %v3285_v17 = vld [vmem:[#allocation2 + $0x264] ss:$16 sps:$4 sm:$0xff]   ;;  %v3288_v18 = vld [vmem:[#allocation2 + $0x24c] ss:$16 sps:$4 sm:$0xff]   ;;  %v3283_v19 = vld [vmem:[#allocation2 + $0x260] ss:$16 sps:$4 sm:$0xff]  }
  0x67   :  { %1525 = vmatprep.subr.bf16.mxu1 %v3212_v31  ;;  %v3286_v20 = vld [vmem:[#allocation2 + $0x248] ss:$16 sps:$4 sm:$0xff]   ;;  %v3291_v21 = vld [vmem:[#allocation2 + $0x284] ss:$16 sps:$4 sm:$0xff]   ;;  %v3294_v22 = vld [vmem:[#allocation2 + $0x26c] ss:$16 sps:$4 sm:$0xff]  }
  0x68   :  { %v3289_v23 = vld [vmem:[#allocation2 + $0x280] ss:$16 sps:$4 sm:$0xff]   ;;  %v3292_v24 = vld [vmem:[#allocation2 + $0x268] ss:$16 sps:$4 sm:$0xff]   ;;  %v3297_v25 = vld [vmem:[#allocation2 + $0x2a4] ss:$16 sps:$4 sm:$0xff]  }
  0x69   :  { %1356 = vmatpush1.bf16.msra.mxu0 %v3213_v32  ;;  %v3300_v26 = vld [vmem:[#allocation2 + $0x28c] ss:$16 sps:$4 sm:$0xff]   ;;  %v3295_v27 = vld [vmem:[#allocation2 + $0x2a0] ss:$16 sps:$4 sm:$0xff]   ;;  %v3298_v28 = vld [vmem:[#allocation2 + $0x288] ss:$16 sps:$4 sm:$0xff]  }
  0x6a   :  { %1526 = vmatpush1.bf16.msra.mxu1 %v3210_v33  ;;  %1357 = vmatprep.subr.bf16.mxu0 %v3214_v34  ;;  %v3303_v29 = vld [vmem:[#allocation2 + $0x2c4] ss:$16 sps:$4 sm:$0xff]   ;;  %v3306_v30 = vld [vmem:[#allocation2 + $0x2ac] ss:$16 sps:$4 sm:$0xff]   ;;  %v3301_v31 = vld [vmem:[#allocation2 + $0x2c0] ss:$16 sps:$4 sm:$0xff]  }
  0x6b   :  { %1527 = vmatprep.subr.bf16.mxu1 %v3218_v35  ;;  %v3304_v32 = vld [vmem:[#allocation2 + $0x2a8] ss:$16 sps:$4 sm:$0xff]   ;;  %v3309_v34 = vld [vmem:[#allocation2 + $0x2e4] ss:$16 sps:$4 sm:$0xff]   ;;  %v3312_v35 = vld [vmem:[#allocation2 + $0x2cc] ss:$16 sps:$4 sm:$0xff]  }
  0x6c   :  { %v3363_v33 = vld [vmem:[%s4233_s0 + $0xc] ss:$28 sps:$4 sm:$0xff]   ;;  %v3333_v50 = vld [vmem:[#allocation2 + $0x364] ss:$16 sps:$4 sm:$0xff]   ;;  %vm3714_vm1 = vmmov 0   ;;  %vm2633_vm2 = vcmask 523264  }
  0x6d   :  { %1358 = vmatpush1.bf16.msra.mxu0 %v3219_v37  ;;  %v3310_v37 = vld [vmem:[#allocation2 + $0x2c8] ss:$16 sps:$4 sm:$0xff]  }
  0x6e   :  { %1528 = vmatpush1.bf16.msra.mxu1 %v3216_v36  ;;  %1359 = vmatprep.subr.bf16.mxu0 %v3220_v38  ;;  %v3307_v36 = vld [vmem:[#allocation2 + $0x2e0] ss:$16 sps:$4 sm:$0xff]   ;;  %v3315_v38 = vld [vmem:[#allocation2 + $0x304] ss:$16 sps:$4 sm:$0xff]  }
  0x6f   :  { %1529 = vmatprep.subr.bf16.mxu1 %v3224_v39  ;;  %v3318_v39 = vld [vmem:[#allocation2 + $0x2ec] ss:$16 sps:$4 sm:$0xff]  }
  0x71   :  { %1360 = vmatpush1.bf16.msra.mxu0 %v3225_v40  ;;  %v3313_v40 = vld [vmem:[#allocation2 + $0x300] ss:$16 sps:$4 sm:$0xff]  }
  0x72   :  { %1530 = vmatpush1.bf16.msra.mxu1 %v3222_v41  ;;  %1361 = vmatprep.subr.bf16.mxu0 %v3226_v42  ;;  %v3316_v41 = vld [vmem:[#allocation2 + $0x2e8] ss:$16 sps:$4 sm:$0xff]   ;;  %v3321_v42 = vld [vmem:[#allocation2 + $0x324] ss:$16 sps:$4 sm:$0xff]  }
  0x73   :  { %1531 = vmatprep.subr.bf16.mxu1 %v3230_v43  ;;  %v3324_v43 = vld [vmem:[#allocation2 + $0x30c] ss:$16 sps:$4 sm:$0xff]  }
  0x75   :  { %1362 = vmatpush1.bf16.msra.mxu0 %v3231_v45  ;;  %v3322_v45 = vld [vmem:[#allocation2 + $0x308] ss:$16 sps:$4 sm:$0xff]  }
  0x76   :  { %1532 = vmatpush1.bf16.msra.mxu1 %v3228_v44  ;;  %1363 = vmatprep.subr.bf16.mxu0 %v3232_v46  ;;  %v3319_v44 = vld [vmem:[#allocation2 + $0x320] ss:$16 sps:$4 sm:$0xff]   ;;  %v3327_v46 = vld [vmem:[#allocation2 + $0x344] ss:$16 sps:$4 sm:$0xff]  }
  0x77   :  { %1533 = vmatprep.subr.bf16.mxu1 %v3236_v47  ;;  %v3330_v47 = vld [vmem:[#allocation2 + $0x32c] ss:$16 sps:$4 sm:$0xff]  }
  0x79   :  { %1364 = vmatpush1.bf16.msra.mxu0 %v3237_v49  ;;  %v3328_v49 = vld [vmem:[#allocation2 + $0x328] ss:$16 sps:$4 sm:$0xff]  }
  0x7a   :  { %1534 = vmatpush1.bf16.msra.mxu1 %v3234_v48  ;;  %1365 = vmatprep.subr.bf16.mxu0 %v3238_v51  ;;  %v3325_v48 = vld [vmem:[#allocation2 + $0x340] ss:$16 sps:$4 sm:$0xff]   ;;  %v3336_v51 = vld [vmem:[#allocation2 + $0x34c] ss:$16 sps:$4 sm:$0xff]  }
  0x7b   :  { %1535 = vmatprep.subr.bf16.mxu1 %v3242_v52  ;;  %v3331_v52 = vld [vmem:[#allocation2 + $0x360] ss:$16 sps:$4 sm:$0xff]  }
  0x7d   :  { %1366 = vmatpush1.bf16.msra.mxu0 %v3243_v54  ;;  %v3339_v54 = vld [vmem:[#allocation2 + $0x384] ss:$16 sps:$4 sm:$0xff]  }
  0x7e   :  { %1536 = vmatpush1.bf16.msra.mxu1 %v3240_v53  ;;  %1367 = vmatprep.subr.bf16.mxu0 %v3244_v55  ;;  %v3334_v53 = vld [vmem:[#allocation2 + $0x348] ss:$16 sps:$4 sm:$0xff]   ;;  %v3342_v55 = vld [vmem:[#allocation2 + $0x36c] ss:$16 sps:$4 sm:$0xff]  }
  0x7f   :  { %1537 = vmatprep.subr.bf16.mxu1 %v3248_v56  ;;  %v3337_v56 = vld [vmem:[#allocation2 + $0x380] ss:$16 sps:$4 sm:$0xff]  }
  0x81   :  { %1368 = vmatpush1.bf16.msra.mxu0 %v3249_v58  ;;  %v3345_v58 = vld [vmem:[#allocation2 + $0x3a4] ss:$16 sps:$4 sm:$0xff]  }
  0x82   :  { %1538 = vmatpush1.bf16.msra.mxu1 %v3246_v57  ;;  %1369 = vmatprep.subr.bf16.mxu0 %v3250_v59  ;;  %v3340_v57 = vld [vmem:[#allocation2 + $0x368] ss:$16 sps:$4 sm:$0xff]   ;;  %v3348_v59 = vld [vmem:[#allocation2 + $0x38c] ss:$16 sps:$4 sm:$0xff]  }
  0x83   :  { %1539 = vmatprep.subr.bf16.mxu1 %v3254_v60  ;;  %v3343_v60 = vld [vmem:[#allocation2 + $0x3a0] ss:$16 sps:$4 sm:$0xff]  }
  0x85   :  { %1370 = vmatpush1.bf16.msra.mxu0 %v3255_v62  ;;  %v3351_v62 = vld [vmem:[#allocation2 + $0x3c4] ss:$16 sps:$4 sm:$0xff]  }
  0x86   :  { %1540 = vmatpush1.bf16.msra.mxu1 %v3252_v61  ;;  %1371 = vmatprep.subr.bf16.mxu0 %v3256_v63  ;;  %v3346_v61 = vld [vmem:[#allocation2 + $0x388] ss:$16 sps:$4 sm:$0xff]   ;;  %v3354_v63 = vld [vmem:[#allocation2 + $0x3ac] ss:$16 sps:$4 sm:$0xff]  }
  0x87   :  { %1541 = vmatprep.subr.bf16.mxu1 %v3260_v1  ;;  %v3349_v1 = vld [vmem:[#allocation2 + $0x3c0] ss:$16 sps:$4 sm:$0xff]  }
  0x89   :  { %1372 = vmatpush1.bf16.msra.mxu0 %v3261_v3  ;;  %v3357_v3 = vld [vmem:[#allocation2 + $0x3e4] ss:$16 sps:$4 sm:$0xff]  }
  0x8a   :  { %1542 = vmatpush1.bf16.msra.mxu1 %v3258_v2  ;;  %1384 = vmatprep.subr.bf16.mxu0 %v3267_v4  ;;  %v3352_v2 = vld [vmem:[#allocation2 + $0x3a8] ss:$16 sps:$4 sm:$0xff]   ;;  %v3360_v4 = vld [vmem:[#allocation2 + $0x3cc] ss:$16 sps:$4 sm:$0xff]  }
  0x8b   :  { %1543 = vmatprep.subr.bf16.mxu1 %v3270_v5  ;;  %v3355_v5 = vld [vmem:[#allocation2 + $0x3e0] ss:$16 sps:$4 sm:$0xff]  }
  0x8c   :  { %1374 = vmatmul.mubr.bf16.vlgmr.msra.gmra.mrb[0].mxu0 %v3262_v6 }
  0x8d   :  { %1385 = vmatpush1.bf16.msra.mxu0 %v3265_v7  ;;  %1416 = vmatprep.mubr.bf16.mxu0 %v3363_v33  ;;  %v3366_v7 = vld [vmem:[#allocation2 + $0x404] ss:$16 sps:$4 sm:$0xff]  }
  0x8e   :  { %1544 = vmatpush1.bf16.msra.mxu1 %v3268_v8  ;;  %1386 = vmatprep.subr.bf16.mxu0 %v3273_v9  ;;  %v3369_v8 = vld [vmem:[#allocation2 + $0x3ec] ss:$16 sps:$4 sm:$0xff]   ;;  %v3361_v9 = vld [vmem:[%s4233_s0 + $0x8] ss:$28 sps:$4 sm:$0xff]  }
  0x8f   :  { %1556 = vmatprep.subr.bf16.mxu1 %v3276_v10  ;;  %v3364_v10 = vld [vmem:[#allocation2 + $0x400] ss:$16 sps:$4 sm:$0xff]  }
  0x91   :  { %1387 = vmatpush1.bf16.msra.mxu0 %v3271_v11  ;;  %1546 = vmatmul.mubr.bf16.vlgmr.msra.gmra.mrb[4].mxu1 %v3262_v6  ;;  %v3358_v6 = vld [vmem:[#allocation2 + $0x3c8] ss:$16 sps:$4 sm:$0xff]  }
  0x92   :  { %1557 = vmatpush1.bf16.msra.mxu1 %v3274_v12  ;;  %1388 = vmatprep.subr.bf16.mxu0 %v3279_v13  ;;  %v3367_v11 = vld [vmem:[#allocation2 + $0x3e8] ss:$16 sps:$4 sm:$0xff]   ;;  %v3372_v12 = vld [vmem:[#allocation2 + $0x424] ss:$16 sps:$4 sm:$0xff]   ;;  %v3375_v13 = vld [vmem:[#allocation2 + $0x40c] ss:$16 sps:$4 sm:$0xff]  }
  0x93   :  { %1558 = vmatprep.subr.bf16.mxu1 %v3282_v14  ;;  %1588 = vmatprep.mubr.bf16.mxu1 %v3363_v33  ;;  %v3370_v14 = vld [vmem:[#allocation2 + $0x420] ss:$16 sps:$4 sm:$0xff]   ;;  %v3402_v33 = vld [vmem:[#allocation2 + $0x4c4] ss:$16 sps:$4 sm:$0xff]  }
  0x95   :  { %1389 = vmatpush1.bf16.msra.mxu0 %v3277_v15  ;;  %v3373_v15 = vld [vmem:[#allocation2 + $0x408] ss:$16 sps:$4 sm:$0xff]  }
  0x96   :  { %1559 = vmatpush1.bf16.msra.mxu1 %v3280_v16  ;;  %1390 = vmatprep.subr.bf16.mxu0 %v3285_v17  ;;  %v3462_v16 = vld [vmem:[%s4233_s0 + $0x14] ss:$28 sps:$4 sm:$0xff]  }
  0x97   :  { %1560 = vmatprep.subr.bf16.mxu1 %v3288_v18  ;;  %v3378_v17 = vld [vmem:[#allocation2 + $0x444] ss:$16 sps:$4 sm:$0xff]   ;;  %v3381_v18 = vld [vmem:[#allocation2 + $0x42c] ss:$16 sps:$4 sm:$0xff]  }
  0x99   :  { %1391 = vmatpush1.bf16.msra.mxu0 %v3283_v19  ;;  %v3376_v19 = vld [vmem:[#allocation2 + $0x440] ss:$16 sps:$4 sm:$0xff]  }
  0x9a   :  { %1561 = vmatpush1.bf16.msra.mxu1 %v3286_v20  ;;  %1392 = vmatprep.subr.bf16.mxu0 %v3291_v21  ;;  %v3379_v20 = vld [vmem:[#allocation2 + $0x428] ss:$16 sps:$4 sm:$0xff]   ;;  %v3384_v21 = vld [vmem:[#allocation2 + $0x464] ss:$16 sps:$4 sm:$0xff]  }
  0x9b   :  { %1562 = vmatprep.subr.bf16.mxu1 %v3294_v22  ;;  %v3387_v22 = vld [vmem:[#allocation2 + $0x44c] ss:$16 sps:$4 sm:$0xff]  }
  0x9d   :  { %1393 = vmatpush1.bf16.msra.mxu0 %v3289_v23  ;;  %v3382_v23 = vld [vmem:[#allocation2 + $0x460] ss:$16 sps:$4 sm:$0xff]  }
  0x9e   :  { %1563 = vmatpush1.bf16.msra.mxu1 %v3292_v24  ;;  %1394 = vmatprep.subr.bf16.mxu0 %v3297_v25  ;;  %v3385_v24 = vld [vmem:[#allocation2 + $0x448] ss:$16 sps:$4 sm:$0xff]   ;;  %v3390_v25 = vld [vmem:[#allocation2 + $0x484] ss:$16 sps:$4 sm:$0xff]  }
  0x9f   :  { %1564 = vmatprep.subr.bf16.mxu1 %v3300_v26  ;;  %v3393_v26 = vld [vmem:[#allocation2 + $0x46c] ss:$16 sps:$4 sm:$0xff]  }
  0xa1   :  { %1395 = vmatpush1.bf16.msra.mxu0 %v3295_v27  ;;  %v3388_v27 = vld [vmem:[#allocation2 + $0x480] ss:$16 sps:$4 sm:$0xff]  }
  0xa2   :  { %1565 = vmatpush1.bf16.msra.mxu1 %v3298_v28  ;;  %1396 = vmatprep.subr.bf16.mxu0 %v3303_v29  ;;  %v3391_v28 = vld [vmem:[#allocation2 + $0x468] ss:$16 sps:$4 sm:$0xff]   ;;  %v3396_v29 = vld [vmem:[#allocation2 + $0x4a4] ss:$16 sps:$4 sm:$0xff]  }
  0xa3   :  { %1566 = vmatprep.subr.bf16.mxu1 %v3306_v30  ;;  %v3399_v30 = vld [vmem:[#allocation2 + $0x48c] ss:$16 sps:$4 sm:$0xff]  }
  0xa5   :  { %1397 = vmatpush1.bf16.msra.mxu0 %v3301_v31  ;;  %v3394_v31 = vld [vmem:[#allocation2 + $0x4a0] ss:$16 sps:$4 sm:$0xff]  }
  0xa6   :  { %1567 = vmatpush1.bf16.msra.mxu1 %v3304_v32  ;;  %1398 = vmatprep.subr.bf16.mxu0 %v3309_v34  ;;  %v3397_v32 = vld [vmem:[#allocation2 + $0x488] ss:$16 sps:$4 sm:$0xff]   ;;  %v3405_v34 = vld [vmem:[#allocation2 + $0x4ac] ss:$16 sps:$4 sm:$0xff]  }
  0xa7   :  { %1568 = vmatprep.subr.bf16.mxu1 %v3312_v35  ;;  %v3400_v35 = vld [vmem:[#allocation2 + $0x4c0] ss:$16 sps:$4 sm:$0xff]  }
  0xa9   :  { %1399 = vmatpush1.bf16.msra.mxu0 %v3307_v36  ;;  %v3403_v36 = vld [vmem:[#allocation2 + $0x4a8] ss:$16 sps:$4 sm:$0xff]  }
  0xaa   :  { %1569 = vmatpush1.bf16.msra.mxu1 %v3310_v37  ;;  %1400 = vmatprep.subr.bf16.mxu0 %v3315_v38  ;;  %v3408_v37 = vld [vmem:[#allocation2 + $0x4e4] ss:$16 sps:$4 sm:$0xff]   ;;  %v3411_v38 = vld [vmem:[#allocation2 + $0x4cc] ss:$16 sps:$4 sm:$0xff]  }
  0xab   :  { %1570 = vmatprep.subr.bf16.mxu1 %v3318_v39  ;;  %v3406_v39 = vld [vmem:[#allocation2 + $0x4e0] ss:$16 sps:$4 sm:$0xff]  }
  0xad   :  { %1401 = vmatpush1.bf16.msra.mxu0 %v3313_v40  ;;  %v3409_v40 = vld [vmem:[#allocation2 + $0x4c8] ss:$16 sps:$4 sm:$0xff]  }
  0xae   :  { %1571 = vmatpush1.bf16.msra.mxu1 %v3316_v41  ;;  %1402 = vmatprep.subr.bf16.mxu0 %v3321_v42  ;;  %v3414_v41 = vld [vmem:[#allocation2 + $0x504] ss:$16 sps:$4 sm:$0xff]   ;;  %v3417_v42 = vld [vmem:[#allocation2 + $0x4ec] ss:$16 sps:$4 sm:$0xff]  }
  0xaf   :  { %1572 = vmatprep.subr.bf16.mxu1 %v3324_v43  ;;  %v3412_v43 = vld [vmem:[#allocation2 + $0x500] ss:$16 sps:$4 sm:$0xff]  }
  0xb1   :  { %1403 = vmatpush1.bf16.msra.mxu0 %v3319_v44  ;;  %v3415_v44 = vld [vmem:[#allocation2 + $0x4e8] ss:$16 sps:$4 sm:$0xff]  }
  0xb2   :  { %1573 = vmatpush1.bf16.msra.mxu1 %v3322_v45  ;;  %1404 = vmatprep.subr.bf16.mxu0 %v3327_v46  ;;  %v3420_v45 = vld [vmem:[#allocation2 + $0x524] ss:$16 sps:$4 sm:$0xff]   ;;  %v3423_v46 = vld [vmem:[#allocation2 + $0x50c] ss:$16 sps:$4 sm:$0xff]  }
  0xb3   :  { %1574 = vmatprep.subr.bf16.mxu1 %v3330_v47  ;;  %v3418_v47 = vld [vmem:[#allocation2 + $0x520] ss:$16 sps:$4 sm:$0xff]  }
  0xb5   :  { %1405 = vmatpush1.bf16.msra.mxu0 %v3325_v48  ;;  %v3421_v48 = vld [vmem:[#allocation2 + $0x508] ss:$16 sps:$4 sm:$0xff]  }
  0xb6   :  { %1575 = vmatpush1.bf16.msra.mxu1 %v3328_v49  ;;  %1406 = vmatprep.subr.bf16.mxu0 %v3333_v50  ;;  %v3426_v49 = vld [vmem:[#allocation2 + $0x544] ss:$16 sps:$4 sm:$0xff]   ;;  %v3429_v50 = vld [vmem:[#allocation2 + $0x52c] ss:$16 sps:$4 sm:$0xff]  }
  0xb7   :  { %1576 = vmatprep.subr.bf16.mxu1 %v3336_v51  ;;  %v3424_v51 = vld [vmem:[#allocation2 + $0x540] ss:$16 sps:$4 sm:$0xff]  }
  0xb9   :  { %1407 = vmatpush1.bf16.msra.mxu0 %v3331_v52  ;;  %v3427_v52 = vld [vmem:[#allocation2 + $0x528] ss:$16 sps:$4 sm:$0xff]  }
  0xba   :  { %1577 = vmatpush1.bf16.msra.mxu1 %v3334_v53  ;;  %1408 = vmatprep.subr.bf16.mxu0 %v3339_v54  ;;  %v3432_v53 = vld [vmem:[#allocation2 + $0x564] ss:$16 sps:$4 sm:$0xff]   ;;  %v3435_v54 = vld [vmem:[#allocation2 + $0x54c] ss:$16 sps:$4 sm:$0xff]  }
  0xbb   :  { %1578 = vmatprep.subr.bf16.mxu1 %v3342_v55  ;;  %v3430_v55 = vld [vmem:[#allocation2 + $0x560] ss:$16 sps:$4 sm:$0xff]  }
  0xbd   :  { %1409 = vmatpush1.bf16.msra.mxu0 %v3337_v56  ;;  %v3433_v56 = vld [vmem:[#allocation2 + $0x548] ss:$16 sps:$4 sm:$0xff]  }
  0xbe   :  { %1579 = vmatpush1.bf16.msra.mxu1 %v3340_v57  ;;  %1410 = vmatprep.subr.bf16.mxu0 %v3345_v58  ;;  %v3438_v57 = vld [vmem:[#allocation2 + $0x584] ss:$16 sps:$4 sm:$0xff]   ;;  %v3441_v58 = vld [vmem:[#allocation2 + $0x56c] ss:$16 sps:$4 sm:$0xff]  }
  0xbf   :  { %1580 = vmatprep.subr.bf16.mxu1 %v3348_v59  ;;  %v3436_v59 = vld [vmem:[#allocation2 + $0x580] ss:$16 sps:$4 sm:$0xff]  }
  0xc1   :  { %1411 = vmatpush1.bf16.msra.mxu0 %v3343_v60  ;;  %v3439_v60 = vld [vmem:[#allocation2 + $0x568] ss:$16 sps:$4 sm:$0xff]  }
  0xc2   :  { %1581 = vmatpush1.bf16.msra.mxu1 %v3346_v61  ;;  %1412 = vmatprep.subr.bf16.mxu0 %v3351_v62  ;;  %v3444_v61 = vld [vmem:[#allocation2 + $0x5a4] ss:$16 sps:$4 sm:$0xff]   ;;  %v3447_v62 = vld [vmem:[#allocation2 + $0x58c] ss:$16 sps:$4 sm:$0xff]  }
  0xc3   :  { %1582 = vmatprep.subr.bf16.mxu1 %v3354_v63  ;;  %v3442_v63 = vld [vmem:[#allocation2 + $0x5a0] ss:$16 sps:$4 sm:$0xff]  }
  0xc5   :  { %1413 = vmatpush1.bf16.msra.mxu0 %v3349_v1  ;;  %v3445_v1 = vld [vmem:[#allocation2 + $0x588] ss:$16 sps:$4 sm:$0xff]  }
  0xc6   :  { %1583 = vmatpush1.bf16.msra.mxu1 %v3352_v2  ;;  %1414 = vmatprep.subr.bf16.mxu0 %v3357_v3  ;;  %v3450_v2 = vld [vmem:[#allocation2 + $0x5c4] ss:$16 sps:$4 sm:$0xff]   ;;  %v3453_v3 = vld [vmem:[#allocation2 + $0x5ac] ss:$16 sps:$4 sm:$0xff]  }
  0xc7   :  { %1584 = vmatprep.subr.bf16.mxu1 %v3360_v4  ;;  %v3448_v4 = vld [vmem:[#allocation2 + $0x5c0] ss:$16 sps:$4 sm:$0xff]  }
  0xc9   :  { %1415 = vmatpush1.bf16.msra.mxu0 %v3355_v5  ;;  %v3451_v5 = vld [vmem:[#allocation2 + $0x5a8] ss:$16 sps:$4 sm:$0xff]  }
  0xca   :  { %1585 = vmatpush1.bf16.msra.mxu1 %v3358_v6  ;;  %1427 = vmatprep.subr.bf16.mxu0 %v3366_v7  ;;  %v3456_v6 = vld [vmem:[#allocation2 + $0x5e4] ss:$16 sps:$4 sm:$0xff]   ;;  %v3459_v7 = vld [vmem:[#allocation2 + $0x5cc] ss:$16 sps:$4 sm:$0xff]  }
  0xcb   :  { %1586 = vmatprep.subr.bf16.mxu1 %v3369_v8  ;;  %v3454_v8 = vld [vmem:[#allocation2 + $0x5e0] ss:$16 sps:$4 sm:$0xff]  }
  0xcc   :  { %1417 = vmatmul.mubr.bf16.vlgmr.msra.gmra.mrb[0].mxu0 %v3361_v9 }
  0xcd   :  { %1428 = vmatpush1.bf16.msra.mxu0 %v3364_v10  ;;  %1459 = vmatprep.mubr.bf16.mxu0 %v3462_v16  ;;  %v3471_v10 = vld [vmem:[%s4236_s3 + $0x4] ss:$8 sps:$4 sm:$0xff]  }
  0xce   :  { %1587 = vmatpush1.bf16.msra.mxu1 %v3367_v11  ;;  %1429 = vmatprep.subr.bf16.mxu0 %v3372_v12  ;;  %v3465_v11 = vld [vmem:[#allocation2 + $0x5ec] ss:$16 sps:$4 sm:$0xff]  }
  0xcf   :  { %1599 = vmatprep.subr.bf16.mxu1 %v3375_v13  ;;  %v3460_v12 = vld [vmem:[%s4233_s0 + $0x10] ss:$28 sps:$4 sm:$0xff]   ;;  %v3469_v13 = vld [vmem:[%s4236_s3] ss:$8 sps:$4 sm:$0xff]  }
  0xd1   :  { %1430 = vmatpush1.bf16.msra.mxu0 %v3370_v14  ;;  %1589 = vmatmul.mubr.bf16.vlgmr.msra.gmra.mrb[4].mxu1 %v3361_v9  ;;  %v3457_v9 = vld [vmem:[#allocation2 + $0x5c8] ss:$16 sps:$4 sm:$0xff]  }
  0xd2   :  { %1600 = vmatpush1.bf16.msra.mxu1 %v3373_v15  ;;  %1431 = vmatprep.subr.bf16.mxu0 %v3378_v17  ;;  %v3463_v14 = vld [vmem:[#allocation2 + $0x5e8] ss:$16 sps:$4 sm:$0xff]   ;;  %v3474_v15 = vld [vmem:[%s4236_s3 + $0x14] ss:$8 sps:$4 sm:$0xff]  }
  0xd3   :  { %1601 = vmatprep.subr.bf16.mxu1 %v3381_v18  ;;  %1631 = vmatprep.mubr.bf16.mxu1 %v3462_v16  ;;  %v3468_v16 = vld [vmem:[#allocation2 + $0x60c] ss:$16 sps:$4 sm:$0xff]   ;;  %v3472_v17 = vld [vmem:[%s4236_s3 + $0x10] ss:$8 sps:$4 sm:$0xff]  }
  0xd4   :  { %v3466_v18 = vld [vmem:[#allocation2 + $0x608] ss:$16 sps:$4 sm:$0xff]  }
  0xd5   :  { %1432 = vmatpush1.bf16.msra.mxu0 %v3376_v19  ;;  %v3477_v19 = vld [vmem:[%s4236_s3 + $0x24] ss:$8 sps:$4 sm:$0xff]  }
  0xd6   :  { %1602 = vmatpush1.bf16.msra.mxu1 %v3379_v20  ;;  %1433 = vmatprep.subr.bf16.mxu0 %v3384_v21  ;;  %v3475_v20 = vld [vmem:[%s4236_s3 + $0x20] ss:$8 sps:$4 sm:$0xff]   ;;  %v3480_v21 = vld [vmem:[%s4236_s3 + $0x34] ss:$8 sps:$4 sm:$0xff]  }
  0xd7   :  { %1603 = vmatprep.subr.bf16.mxu1 %v3387_v22  ;;  %v3478_v22 = vld [vmem:[%s4236_s3 + $0x30] ss:$8 sps:$4 sm:$0xff]  }
  0xd9   :  { %1434 = vmatpush1.bf16.msra.mxu0 %v3382_v23  ;;  %v3483_v23 = vld [vmem:[%s4236_s3 + $0x44] ss:$8 sps:$4 sm:$0xff]  }
  0xda   :  { %1604 = vmatpush1.bf16.msra.mxu1 %v3385_v24  ;;  %1435 = vmatprep.subr.bf16.mxu0 %v3390_v25  ;;  %v3486_v24 = vld [vmem:[%s4236_s3 + $0x54] ss:$8 sps:$4 sm:$0xff]  }
  0xdb   :  { %1605 = vmatprep.subr.bf16.mxu1 %v3393_v26  ;;  %v3609_v25 = vld [vmem:[%s4233_s0 + $0x18] ss:$28 sps:$4 sm:$0xff]  }
  0xdc   :  { %v3484_v26 = vld [vmem:[%s4236_s3 + $0x50] ss:$8 sps:$4 sm:$0xff]  }
  0xdd   :  { %1436 = vmatpush1.bf16.msra.mxu0 %v3388_v27  ;;  %v3489_v27 = vld [vmem:[%s4236_s3 + $0x64] ss:$8 sps:$4 sm:$0xff]  }
  0xde   :  { %1606 = vmatpush1.bf16.msra.mxu1 %v3391_v28  ;;  %1437 = vmatprep.subr.bf16.mxu0 %v3396_v29  ;;  %v3487_v28 = vld [vmem:[%s4236_s3 + $0x60] ss:$8 sps:$4 sm:$0xff]   ;;  %v3492_v29 = vld [vmem:[%s4236_s3 + $0x74] ss:$8 sps:$4 sm:$0xff]  }
  0xdf   :  { %1607 = vmatprep.subr.bf16.mxu1 %v3399_v30 }
  0xe1   :  { %1438 = vmatpush1.bf16.msra.mxu0 %v3394_v31 }
  0xe2   :  { %1608 = vmatpush1.bf16.msra.mxu1 %v3397_v32  ;;  %1439 = vmatprep.subr.bf16.mxu0 %v3402_v33  ;;  %v3490_v32 = vld [vmem:[%s4236_s3 + $0x70] ss:$8 sps:$4 sm:$0xff]  }
  0xe3   :  { %1609 = vmatprep.subr.bf16.mxu1 %v3405_v34  ;;  %v3495_v34 = vld [vmem:[%s4236_s3 + $0x84] ss:$8 sps:$4 sm:$0xff]  }
  0xe5   :  { %1440 = vmatpush1.bf16.msra.mxu0 %v3400_v35 }
  0xe6   :  { %1610 = vmatpush1.bf16.msra.mxu1 %v3403_v36  ;;  %1441 = vmatprep.subr.bf16.mxu0 %v3408_v37  ;;  %v3493_v36 = vld [vmem:[%s4236_s3 + $0x80] ss:$8 sps:$4 sm:$0xff]   ;;  %v3498_v37 = vld [vmem:[%s4236_s3 + $0x94] ss:$8 sps:$4 sm:$0xff]  }
  0xe7   :  { %1611 = vmatprep.subr.bf16.mxu1 %v3411_v38  ;;  %v3496_v38 = vld [vmem:[%s4236_s3 + $0x90] ss:$8 sps:$4 sm:$0xff]  }
  0xe9   :  { %1442 = vmatpush1.bf16.msra.mxu0 %v3406_v39  ;;  %v3501_v39 = vld [vmem:[%s4236_s3 + $0xa4] ss:$8 sps:$4 sm:$0xff]  }
  0xea   :  { %1612 = vmatpush1.bf16.msra.mxu1 %v3409_v40  ;;  %1443 = vmatprep.subr.bf16.mxu0 %v3414_v41  ;;  %v3499_v40 = vld [vmem:[%s4236_s3 + $0xa0] ss:$8 sps:$4 sm:$0xff]   ;;  %v3504_v41 = vld [vmem:[%s4236_s3 + $0xb4] ss:$8 sps:$4 sm:$0xff]  }
  0xeb   :  { %1613 = vmatprep.subr.bf16.mxu1 %v3417_v42  ;;  %v3502_v42 = vld [vmem:[%s4236_s3 + $0xb0] ss:$8 sps:$4 sm:$0xff]  }
  0xed   :  { %1444 = vmatpush1.bf16.msra.mxu0 %v3412_v43  ;;  %v3507_v43 = vld [vmem:[%s4236_s3 + $0xc4] ss:$8 sps:$4 sm:$0xff]  }
  0xee   :  { %1614 = vmatpush1.bf16.msra.mxu1 %v3415_v44  ;;  %1445 = vmatprep.subr.bf16.mxu0 %v3420_v45  ;;  %v3505_v44 = vld [vmem:[%s4236_s3 + $0xc0] ss:$8 sps:$4 sm:$0xff]   ;;  %v3510_v45 = vld [vmem:[%s4236_s3 + $0xd4] ss:$8 sps:$4 sm:$0xff]  }
  0xef   :  { %1615 = vmatprep.subr.bf16.mxu1 %v3423_v46  ;;  %v3508_v46 = vld [vmem:[%s4236_s3 + $0xd0] ss:$8 sps:$4 sm:$0xff]  }
  0xf1   :  { %1446 = vmatpush1.bf16.msra.mxu0 %v3418_v47  ;;  %v3513_v47 = vld [vmem:[%s4236_s3 + $0xe4] ss:$8 sps:$4 sm:$0xff]  }
  0xf2   :  { %1616 = vmatpush1.bf16.msra.mxu1 %v3421_v48  ;;  %1447 = vmatprep.subr.bf16.mxu0 %v3426_v49  ;;  %v3511_v48 = vld [vmem:[%s4236_s3 + $0xe0] ss:$8 sps:$4 sm:$0xff]   ;;  %v3516_v49 = vld [vmem:[%s4236_s3 + $0xf4] ss:$8 sps:$4 sm:$0xff]  }
  0xf3   :  { %1617 = vmatprep.subr.bf16.mxu1 %v3429_v50  ;;  %v3514_v50 = vld [vmem:[%s4236_s3 + $0xf0] ss:$8 sps:$4 sm:$0xff]  }
  0xf5   :  { %1448 = vmatpush1.bf16.msra.mxu0 %v3424_v51  ;;  %v3519_v51 = vld [vmem:[%s4236_s3 + $0x104] ss:$8 sps:$4 sm:$0xff]  }
  0xf6   :  { %1618 = vmatpush1.bf16.msra.mxu1 %v3427_v52  ;;  %1449 = vmatprep.subr.bf16.mxu0 %v3432_v53  ;;  %v3565_v52 = vld [vmem:[%s4238_s5 + $0x40] sm:$0xff]  }
  0xf7   :  { %1619 = vmatprep.subr.bf16.mxu1 %v3435_v54  ;;  %v3566_v53 = vld [vmem:[%s4238_s5] sm:$0xff]   ;;  %v3567_v54 = vld [vmem:[%s4238_s5 + $0x48] sm:$0xff]  }
  0xf9   :  { %1450 = vmatpush1.bf16.msra.mxu0 %v3430_v55  ;;  %v3568_v55 = vld [vmem:[%s4238_s5 + $0x8] sm:$0xff]  }
  0xfa   :  { %1620 = vmatpush1.bf16.msra.mxu1 %v3433_v56  ;;  %1451 = vmatprep.subr.bf16.mxu0 %v3438_v57  ;;  %v3569_v56 = vld [vmem:[%s4238_s5 + $0x50] sm:$0xff]  }
  0xfb   :  { %1621 = vmatprep.subr.bf16.mxu1 %v3441_v58  ;;  %v3570_v57 = vld [vmem:[%s4238_s5 + $0x10] sm:$0xff]   ;;  %v3571_v58 = vld [vmem:[%s4238_s5 + $0x58] sm:$0xff]  }
  0xfd   :  { %1452 = vmatpush1.bf16.msra.mxu0 %v3436_v59  ;;  %v3572_v59 = vld [vmem:[%s4238_s5 + $0x18] sm:$0xff]  }
  0xfe   :  { %1622 = vmatpush1.bf16.msra.mxu1 %v3439_v60  ;;  %1453 = vmatprep.subr.bf16.mxu0 %v3444_v61  ;;  %v3573_v60 = vld [vmem:[%s4238_s5 + $0x60] sm:$0xff]  }
  0xff   :  { %1623 = vmatprep.subr.bf16.mxu1 %v3447_v62  ;;  %v3574_v61 = vld [vmem:[%s4238_s5 + $0x20] sm:$0xff]   ;;  %v3575_v62 = vld [vmem:[%s4238_s5 + $0x68] sm:$0xff]  }
 0x101   :  { %1454 = vmatpush1.bf16.msra.mxu0 %v3442_v63  ;;  %v302_v63 = vlaneseq }
 0x102   :  { %1624 = vmatpush1.bf16.msra.mxu1 %v3445_v1  ;;  %1455 = vmatprep.subr.bf16.mxu0 %v3450_v2 }
 0x103   :  { %1625 = vmatprep.subr.bf16.mxu1 %v3453_v3  ;;  %v4015_v1 = vshrl.u32 %v302_v63, 7  ;;  %v300_v3 = vld [vmem:[%s4235_s2] sm:$0xf]  ;;  %v3552_v63 = vld [vmem:[%s4236_s3 + $0x1b4] ss:$8 sps:$4 sm:$0xff]  }
 0x105   :  { %1456 = vmatpush1.bf16.msra.mxu0 %v3448_v4  ;;  %v304_v2 = vsub.s32 0, %v4015_v1  ;;  %v308_v4 = vsub.s32 1, %v4015_v1 }
 0x106   :  { %1626 = vmatpush1.bf16.msra.mxu1 %v3451_v5  ;;  %1457 = vmatprep.subr.bf16.mxu0 %v3456_v6 }
 0x107   :  { %1627 = vmatprep.subr.bf16.mxu1 %v3459_v7  ;;  %v305_v5 = vrot.slane %v300_v3, %v304_v2  ;;  %v309_v6 = vrot.slane %v300_v3, %v308_v4 }
 0x109   :  { %1458 = vmatpush1.bf16.msra.mxu0 %v3454_v8 }
 0x10a   :  { %1628 = vmatpush1.bf16.msra.mxu1 %v3457_v9  ;;  %2093 = vmatprep.subr.bf16.mxu0 %v3471_v10 }
 0x10b   :  { %1629 = vmatprep.subr.bf16.mxu1 %v3465_v11 }
 0x10c   :  { %1460 = vmatmul.mubr.bf16.vlgmr.msra.gmra.mrb[0].mxu0 %v3460_v12 }
 0x10d   :  { %2094 = vmatpush1.bf16.msra.mxu0 %v3469_v13 }
 0x10e   :  { %1630 = vmatpush1.bf16.msra.mxu1 %v3463_v14  ;;  %2095 = vmatprep.subr.bf16.mxu0 %v3474_v15 }
 0x10f   :  { %1642 = vmatprep.subr.bf16.mxu1 %v3468_v16 }
 0x111   :  { %1632 = vmatmul.mubr.bf16.vlgmr.msra.gmra.mrb[4].mxu1 %v3460_v12  ;;  %2096 = vmatpush1.bf16.msra.mxu0 %v3472_v17 }
 0x112   :  { %1643 = vmatpush1.bf16.msra.mxu1 %v3466_v18  ;;  %1674 = vmatprep.mubr.bf16.mxu1 %v3712_v0  ;;  %v3481_v0 = vld [vmem:[%s4236_s3 + $0x40] ss:$8 sps:$4 sm:$0xff]  }
 0x113   :  { %2097 = vmatprep.subr.bf16.mxu0 %v3477_v19  ;;  %3017 = vmatprep.subr.bf16.mxu1 %v3565_v52  ;;  %v3532_v52 = vld [vmem:[%s4236_s3 + $0x150] ss:$8 sps:$4 sm:$0xff]  }
 0x115   :  { %2098 = vmatpush1.bf16.msra.mxu0 %v3475_v20 }
 0x116   :  { %2099 = vmatprep.subr.bf16.mxu0 %v3480_v21 }
 0x119   :  { %2100 = vmatpush1.bf16.msra.mxu0 %v3478_v22 }
 0x11a   :  { %2101 = vmatprep.subr.bf16.mxu0 %v3483_v23 }
 0x11d   :  { %2911 = vmatmul.mubr.msk.bf16.vlgmr.msra.gmra.mrb[4].mxu1 %vm1337_vm0, %v3609_v25  ;;  %2102 = vmatpush1.bf16.msra.mxu0 %v3481_v0  ;;  %v312_v25 = vsub.s32 2, %v4015_v1 }
 0x11e   :  { %2103 = vmatprep.subr.bf16.mxu0 %v3486_v24  ;;  %3018 = vmatpush3.bf16.msra.mxu1 %v3566_v53  ;;  %v3517_v24 = vld [vmem:[%s4236_s3 + $0x100] ss:$8 sps:$4 sm:$0xff]   ;;  %v3537_v53 = vld [vmem:[%s4236_s3 + $0x164] ss:$8 sps:$4 sm:$0xff]  }
 0x11f   :  { %3019 = vmatprep.subr.bf16.mxu1 %v3567_v54  ;;  %v3535_v54 = vld [vmem:[%s4236_s3 + $0x160] ss:$8 sps:$4 sm:$0xff]  }
 0x121   :  { %2104 = vmatpush1.bf16.msra.mxu0 %v3484_v26  ;;  %v3522_v26 = vld [vmem:[%s4236_s3 + $0x114] ss:$8 sps:$4 sm:$0xff]  }
 0x122   :  { %2105 = vmatprep.subr.bf16.mxu0 %v3489_v27  ;;  %3020 = vmatpush3.bf16.msra.mxu1 %v3568_v55  ;;  %v316_v27 = vsub.s32 3, %v4015_v1  ;;  %v3540_v55 = vld [vmem:[%s4236_s3 + $0x174] ss:$8 sps:$4 sm:$0xff]   ;;  %v3582_v1 = vld [vmem:[%s4240_s7 + $0x8] sm:$0xff]  }
 0x123   :  { %3021 = vmatprep.subr.bf16.mxu1 %v3569_v56  ;;  %v3538_v56 = vld [vmem:[%s4236_s3 + $0x170] ss:$8 sps:$4 sm:$0xff]  }
 0x124   :  { %v3920_v30 = vpop.f32.mrb[0].mxu1 }
 0x125   :  { %v3922_v31 = vpop.f32.mrb[1].mxu1  ;;  %2106 = vmatpush1.bf16.msra.mxu0 %v3487_v28  ;;  %v313_v28 = vrot.slane %v300_v3, %v312_v25 }
 0x126   :  { %v3927_v33 = vpop.f32.mrb[2].mxu1  ;;  %2107 = vmatprep.subr.bf16.mxu0 %v3492_v29  ;;  %3022 = vmatpush3.bf16.msra.mxu1 %v3570_v57  ;;  %v3520_v29 = vld [vmem:[%s4236_s3 + $0x110] ss:$8 sps:$4 sm:$0xff]   ;;  %v3543_v57 = vld [vmem:[%s4236_s3 + $0x184] ss:$8 sps:$4 sm:$0xff]  }
 0x127   :  { %v3932_v35 = vpop.f32.mrb[3].mxu1  ;;  %3023 = vmatprep.subr.bf16.mxu1 %v3571_v58  ;;  %v3541_v58 = vld [vmem:[%s4236_s3 + $0x180] ss:$8 sps:$4 sm:$0xff]  }
 0x129   :  { %2108 = vmatpush1.bf16.msra.mxu0 %v3490_v32 }
 0x12a   :  { %2109 = vmatprep.subr.bf16.mxu0 %v3495_v34  ;;  %3024 = vmatpush3.bf16.msra.mxu1 %v3572_v59  ;;  %v3546_v59 = vld [vmem:[%s4236_s3 + $0x194] ss:$8 sps:$4 sm:$0xff]  }
 0x12b   :  { %3025 = vmatprep.subr.bf16.mxu1 %v3573_v60  ;;  %v3544_v60 = vld [vmem:[%s4236_s3 + $0x190] ss:$8 sps:$4 sm:$0xff]  }
 0x12d   :  { %2110 = vmatpush1.bf16.msra.mxu0 %v3493_v36 }
 0x12e   :  { %2111 = vmatprep.subr.bf16.mxu0 %v3498_v37  ;;  %3026 = vmatpush3.bf16.msra.mxu1 %v3574_v61  ;;  %v3549_v61 = vld [vmem:[%s4236_s3 + $0x1a4] ss:$8 sps:$4 sm:$0xff]  }
 0x12f   :  { %3027 = vmatprep.subr.bf16.mxu1 %v3575_v62  ;;  %v3547_v62 = vld [vmem:[%s4236_s3 + $0x1a0] ss:$8 sps:$4 sm:$0xff]  }
 0x131   :  { %2112 = vmatpush1.bf16.msra.mxu0 %v3496_v38  ;;  %v3528_v38 = vld [vmem:[%s4236_s3 + $0x134] ss:$8 sps:$4 sm:$0xff]  }
 0x132   :  { %2113 = vmatprep.subr.bf16.mxu0 %v3501_v39 }
 0x135   :  { %2114 = vmatpush1.bf16.msra.mxu0 %v3499_v40 }
 0x136   :  { %2115 = vmatprep.subr.bf16.mxu0 %v3504_v41 }
 0x139   :  { %2116 = vmatpush1.bf16.msra.mxu0 %v3502_v42 }
 0x13a   :  { %2117 = vmatprep.subr.bf16.mxu0 %v3507_v43 }
 0x13d   :  { %2118 = vmatpush1.bf16.msra.mxu0 %v3505_v44  ;;  %v3526_v44 = vld [vmem:[%s4236_s3 + $0x130] ss:$8 sps:$4 sm:$0xff]  }
 0x13e   :  { %2119 = vmatprep.subr.bf16.mxu0 %v3510_v45 }
 0x141   :  { %2120 = vmatpush1.bf16.msra.mxu0 %v3508_v46 }
 0x142   :  { %2121 = vmatprep.subr.bf16.mxu0 %v3513_v47  ;;  %v3531_v47 = vld [vmem:[%s4236_s3 + $0x144] ss:$8 sps:$4 sm:$0xff]  }
 0x145   :  { %2122 = vmatpush1.bf16.msra.mxu0 %v3511_v48 }
 0x146   :  { %2123 = vmatprep.subr.bf16.mxu0 %v3516_v49 }
 0x149   :  { %2124 = vmatpush1.bf16.msra.mxu0 %v3514_v50  ;;  %v3529_v50 = vld [vmem:[%s4236_s3 + $0x140] ss:$8 sps:$4 sm:$0xff]  }
 0x14a   :  { %2136 = vmatprep.subr.bf16.mxu0 %v3519_v51  ;;  %v3534_v51 = vld [vmem:[%s4236_s3 + $0x154] ss:$8 sps:$4 sm:$0xff]  }
 0x1df   :  { %v1461_v7 = vpop.f32.mrb[0].mxu0 }
 0x1e0   :  { %v3114_v8 = vadd.f32 %v1461_v7, %v305_v5  ;;  %v1463_v9 = vpop.f32.mrb[1].mxu0  ;;  %v3558_v7 = vld [vmem:[%s4236_s3 + $0x1d4] ss:$8 sps:$4 sm:$0xff]  }
 0x1e1   :  { %v3116_v10 = vadd.f32 %v1463_v9, %v309_v6  ;;  %v1465_v11 = vpop.f32.mrb[2].mxu0  ;;  %v3561_v9 = vld [vmem:[%s4236_s3 + $0x1e4] ss:$8 sps:$4 sm:$0xff]  }
 0x1e2   :  { %v3115_v12 = vadd.f32 %v3114_v8, %v3920_v30  ;;  %v3118_v13 = vadd.f32 %v1465_v11, %v305_v5  ;;  %v1467_v14 = vpop.f32.mrb[3].mxu0  ;;  %v317_v30 = vrot.slane %v300_v3, %v316_v27  ;;  %v3550_v3 = vld [vmem:[%s4236_s3 + $0x1b0] ss:$8 sps:$4 sm:$0xff]   ;;  %v3555_v5 = vld [vmem:[%s4236_s3 + $0x1c4] ss:$8 sps:$4 sm:$0xff]  }
 0x1e3   :  { %v3117_v15 = vadd.f32 %v3116_v10, %v3922_v31  ;;  %v3120_v16 = vadd.f32 %v1467_v14, %v309_v6  ;;  %v3525_v31 = vld [vmem:[%s4236_s3 + $0x124] ss:$8 sps:$4 sm:$0xff]   ;;  %v3553_v6 = vld [vmem:[%s4236_s3 + $0x1c0] ss:$8 sps:$4 sm:$0xff]   ;;  %v3556_v8 = vld [vmem:[%s4236_s3 + $0x1d0] ss:$8 sps:$4 sm:$0xff]  }
 0x1e4   :  { %v3119_v17 = vadd.f32 %v3118_v13, %v3927_v33  ;;  %v1685_v19 = vmax.f32 %v3115_v12, 0.0  ;;  %v3559_v10 = vld [vmem:[%s4236_s3 + $0x1e0] ss:$8 sps:$4 sm:$0xff]   ;;  %v3564_v11 = vld [vmem:[%s4236_s3 + $0x1f4] ss:$8 sps:$4 sm:$0xff]  }
 0x1e5   :  { %v3121_v18 = vadd.f32 %v3120_v16, %v3932_v35  ;;  %v1686_v21 = vmax.f32 %v3117_v15, 0.0  ;;  %v3523_v35 = vld [vmem:[%s4236_s3 + $0x120] ss:$8 sps:$4 sm:$0xff]   ;;  %v3562_v12 = vld [vmem:[%s4236_s3 + $0x1f0] ss:$8 sps:$4 sm:$0xff]  }
 0x1e6   :  { %v1689_v20 = vmax.f32 %v3119_v17, 0.0  ;;  %v3576_v13 = vld [vmem:[%s4238_s5 + $0x28] sm:$0xff]   ;;  %v3577_v14 = vld [vmem:[%s4238_s5 + $0x70] sm:$0xff]   ;;  %v3579_v16 = vld [vmem:[%s4238_s5 + $0x78] sm:$0xff]  }
 0x1e7   :  { %v1690_v22 = vmax.f32 %v3121_v18, 0.0  ;;  %3028 = vmatpush3.bf16.msra.mxu1 %v3576_v13  ;;  %v3578_v15 = vld [vmem:[%s4238_s5 + $0x30] sm:$0xff]   ;;  %v3580_v17 = vld [vmem:[%s4238_s5 + $0x38] sm:$0xff]   ;;  %v3713_v18 = vmov 0.0  }
 0x1e8   :  { %v1693_v23 = vpack.c.bf16 %v1689_v20, %v1685_v19  ;;  %3029 = vmatprep.subr.bf16.mxu1 %v3577_v14  ;;  %v1761_v19 = vld [vmem:[%s4237_s4] sm:$0x3]  ;;  %v3002_v14 = vld [vmem:[#allocation6] ss:$0 sm:$0xff] }
 0x1e9   :  { %v1694_v0 = vpack.c.bf16 %v1690_v22, %v1686_v21  ;;  %v1766_v20 = vrot.slane %v1761_v19, %v304_v2  ;;  %v1770_v21 = vrot.slane %v1761_v19, %v308_v4  ;;  %v3581_v2 = vld [vmem:[%s4240_s7] sm:$0xff]   ;;  %v3583_v4 = vld [vmem:[%s4240_s7 + $0x10] sm:$0xff]  }
 0x1ea   :  { %v3600_v13 = vld [vmem:[#allocation7 + $0x18] sm:$0xff]  }
 0x1eb   :  { %2125 = vmatprep.mubr.bf16.mxu0 %v1694_v0  ;;  %3030 = vmatpush3.bf16.msra.mxu1 %v3578_v15 }
 0x1ec   :  { %2126 = vmatmul.mubr.bf16.vlgmr.msra.gmra.mrb[4].mxu0 %v1693_v23  ;;  %3031 = vmatprep.subr.bf16.mxu1 %v3579_v16 }
 0x1ed   :  { %2137 = vmatpush1.bf16.msra.mxu0 %v3517_v24 }
 0x1ee   :  { %2138 = vmatprep.subr.bf16.mxu0 %v3522_v26 }
 0x1ef   :  { %3032 = vmatpush3.bf16.msra.mxu1 %v3580_v17 }
 0x1f0   :  { %v1676_v32 = vpop.f32.mrb[4].mxu1  ;;  %3062 = vmatprep.subr.bf16.mxu1 %v3713_v18 }
 0x1f1   :  { %v3122_v33 = vadd.f32 %v1676_v32, %v313_v28  ;;  %v1678_v34 = vpop.f32.mrb[5].mxu1  ;;  %2139 = vmatpush1.bf16.msra.mxu0 %v3520_v29 }
 0x1f2   :  { %v3123_v36 = vadd.f32 %v1678_v34, %v317_v30  ;;  %v1680_v37 = vpop.f32.mrb[6].mxu1  ;;  %2140 = vmatprep.subr.bf16.mxu0 %v3525_v31 }
 0x1f3   :  { %v3124_v39 = vadd.f32 %v1680_v37, %v313_v28  ;;  %v1682_v40 = vpop.f32.mrb[7].mxu1  ;;  %v1687_v42 = vmax.f32 %v3122_v33, 0.0  ;;  %v3586_v37 = vld [vmem:[%s4240_s7 + $0x28] sm:$0xff]  }
 0x1f4   :  { %v3125_v41 = vadd.f32 %v1682_v40, %v317_v30  ;;  %v1688_v45 = vmax.f32 %v3123_v36, 0.0  ;;  %v3585_v36 = vld [vmem:[%s4240_s7 + $0x20] sm:$0xff]  }
 0x1f5   :  { %v1691_v43 = vmax.f32 %v3124_v39, 0.0  ;;  %2141 = vmatpush1.bf16.msra.mxu0 %v3523_v35  ;;  %v3584_v35 = vld [vmem:[%s4240_s7 + $0x18] sm:$0xff]  }
 0x1f6   :  { %v1692_v46 = vmax.f32 %v3125_v41, 0.0  ;;  %2142 = vmatprep.subr.bf16.mxu0 %v3528_v38  ;;  %v3587_v38 = vld [vmem:[%s4240_s7 + $0x30] sm:$0xff]   ;;  %v3588_v39 = vld [vmem:[%s4240_s7 + $0x38] sm:$0xff]   ;;  %v2976_v41 = vld [vmem:[%s4239_s6] ss:$0 sm:$0xff] }
 0x1f7   :  { %v1695_v48 = vpack.c.bf16 %v1691_v43, %v1687_v42 }
 0x1f8   :  { %v1696_v49 = vpack.c.bf16 %v1692_v46, %v1688_v45 }
 0x1f9   :  { %2143 = vmatpush1.bf16.msra.mxu0 %v3526_v44 }
 0x1fa   :  { %2168 = vmatprep.mubr.bf16.mxu0 %v1696_v49  ;;  %2144 = vmatprep.subr.bf16.mxu0 %v3531_v47 }
 0x1fd   :  { %2145 = vmatpush1.bf16.msra.mxu0 %v3529_v50 }
 0x1fe   :  { %2146 = vmatprep.subr.bf16.mxu0 %v3534_v51  ;;  %v3589_v51 = vld [vmem:[%s4242_s9] sm:$0xff]  }
 0x201   :  { %2147 = vmatpush1.bf16.msra.mxu0 %v3532_v52 }
 0x202   :  { %2148 = vmatprep.subr.bf16.mxu0 %v3537_v53  ;;  %v3590_v53 = vld [vmem:[%s4242_s9 + $0x8] sm:$0xff]  }
 0x205   :  { %2149 = vmatpush1.bf16.msra.mxu0 %v3535_v54  ;;  %v3591_v54 = vld [vmem:[%s4242_s9 + $0x10] sm:$0xff]  }
 0x206   :  { %2150 = vmatprep.subr.bf16.mxu0 %v3540_v55  ;;  %v3592_v55 = vld [vmem:[%s4242_s9 + $0x18] sm:$0xff]  }
 0x209   :  { %2151 = vmatpush1.bf16.msra.mxu0 %v3538_v56  ;;  %v3593_v56 = vld [vmem:[%s4242_s9 + $0x20] sm:$0xff]  }
 0x20a   :  { %2152 = vmatprep.subr.bf16.mxu0 %v3543_v57  ;;  %v3594_v57 = vld [vmem:[%s4242_s9 + $0x28] sm:$0xff]  }
 0x20d   :  { %2153 = vmatpush1.bf16.msra.mxu0 %v3541_v58  ;;  %v3595_v58 = vld [vmem:[%s4242_s9 + $0x30] sm:$0xff]  }
 0x20e   :  { %2154 = vmatprep.subr.bf16.mxu0 %v3546_v59  ;;  %v3596_v59 = vld [vmem:[%s4242_s9 + $0x38] sm:$0xff]  }
 0x211   :  { %2155 = vmatpush1.bf16.msra.mxu0 %v3544_v60  ;;  %v2993_v60 = vld [vmem:[#allocation4] ss:$0 sm:$0xff] }
 0x212   :  { %2156 = vmatprep.subr.bf16.mxu0 %v3549_v61 }
 0x215   :  { %2157 = vmatpush1.bf16.msra.mxu0 %v3547_v62 }
 0x216   :  { %2158 = vmatprep.subr.bf16.mxu0 %v3552_v63 }
 0x219   :  { %2159 = vmatpush1.bf16.msra.mxu0 %v3550_v3 }
 0x21a   :  { %2160 = vmatprep.subr.bf16.mxu0 %v3555_v5 }
 0x21d   :  { %2161 = vmatpush1.bf16.msra.mxu0 %v3553_v6 }
 0x21e   :  { %2162 = vmatprep.subr.bf16.mxu0 %v3558_v7 }
 0x221   :  { %2163 = vmatpush1.bf16.msra.mxu0 %v3556_v8 }
 0x222   :  { %2164 = vmatprep.subr.bf16.mxu0 %v3561_v9  ;;  %v3597_v9 = vld [vmem:[#allocation7] sm:$0xff]  }
 0x225   :  { %2165 = vmatpush1.bf16.msra.mxu0 %v3559_v10 }
 0x226   :  { %2166 = vmatprep.subr.bf16.mxu0 %v3564_v11  ;;  %v3598_v11 = vld [vmem:[#allocation7 + $0x8] sm:$0xff]  }
 0x229   :  { %2167 = vmatpush1.bf16.msra.mxu0 %v3562_v12  ;;  %v3599_v12 = vld [vmem:[#allocation7 + $0x10] sm:$0xff]  }
 0x22c   :  { %2169 = vmatmul.mubr.bf16.vlgmr.msra.gmra.mrb[4].mxu0 %v1695_v48 }
 0x2ff   :  { %v2170_v22 = vpop.f32.mrb[4].mxu0 }
 0x300   :  { %v3126_v23 = vadd.f32 %v2170_v22, %v1766_v20  ;;  %v2172_v0 = vpop.f32.mrb[5].mxu0 }
 0x301   :  { %v3127_v24 = vadd.f32 %v2172_v0, %v1770_v21  ;;  %v2174_v25 = vpop.f32.mrb[6].mxu0 }
 0x302   :  { %v3128_v26 = vadd.f32 %v2174_v25, %v1766_v20  ;;  %v2176_v27 = vpop.f32.mrb[7].mxu0  ;;  %v2179_v29 = vmax.f32 %v3126_v23, 0.0 }
 0x303   :  { %v3129_v28 = vadd.f32 %v2176_v27, %v1770_v21  ;;  %v2180_v31 = vmax.f32 %v3127_v24, 0.0  ;;  %v3011_v24 = vld [vmem:[%s4245_s12] ss:$0 sm:$0xff] }
 0x304   :  { %v2181_v30 = vmax.f32 %v3128_v26, 0.0 }
 0x305   :  { %v2182_v32 = vmax.f32 %v3129_v28, 0.0 }
 0x306   :  { %v2183_v33 = vpack.c.bf16 %v2181_v30, %v2179_v29 }
 0x307   :  { %v2184_v34 = vpack.c.bf16 %v2182_v32, %v2180_v31 }
 0x309   :  { %2352 = vmatprep.mubr.bf16.mxu1 %v2184_v34 }
 0x30a   :  { %2353 = vmatmul.mubr.bf16.vlgmr.msra.gmra.mrb[8].mxu1 %v2183_v33 }
 0x30b   :  { %3063 = vmatpush3.bf16.msra.mxu1 %v3581_v2  ;;  %3078 = vmatprep.mubr.msk.bf16.mxu1 %vm3714_vm1, %v3713_v18 }
 0x30c   :  { %3064 = vmatprep.subr.bf16.mxu1 %v3713_v18 }
 0x30f   :  { %3065 = vmatpush3.bf16.msra.mxu1 %v3582_v1 }
 0x310   :  { %3066 = vmatprep.subr.bf16.mxu1 %v3713_v18 }
 0x313   :  { %3067 = vmatpush3.bf16.msra.mxu1 %v3583_v4 }
 0x314   :  { %3068 = vmatprep.subr.bf16.mxu1 %v3713_v18 }
 0x317   :  { %3069 = vmatpush3.bf16.msra.mxu1 %v3584_v35 }
 0x318   :  { %3070 = vmatprep.subr.bf16.mxu1 %v3713_v18 }
 0x31b   :  { %3071 = vmatpush3.bf16.msra.mxu1 %v3585_v36 }
 0x31c   :  { %3072 = vmatprep.subr.bf16.mxu1 %v3713_v18 }
 0x31f   :  { %3073 = vmatpush3.bf16.msra.mxu1 %v3586_v37 }
 0x320   :  { %3074 = vmatprep.subr.bf16.mxu1 %v3713_v18 }
 0x323   :  { %3075 = vmatpush3.bf16.msra.mxu1 %v3587_v38 }
 0x324   :  { %3076 = vmatprep.subr.bf16.mxu1 %v3713_v18 }
 0x327   :  { %3077 = vmatpush3.bf16.msra.mxu1 %v3588_v39 }
 0x328   :  { %3082 = vmatprep.subr.bf16.mxu1 %v3713_v18 }
 0x3dd   :  { %v3033_v40 = vpop.f32.mrb[8].mxu1 }
 0x3de   :  { %v3034_v42 = vpop.f32.mrb[9].mxu1 }
 0x3df   :  { %v3035_v43 = vadd.f32 %v3034_v42, %v3033_v40  ;;  %v3036_v44 = vpop.f32.mrb[10].mxu1 }
 0x3e0   :  { %v3037_v45 = vpop.f32.mrb[11].mxu1 }
 0x3e1   :  { %v2355_v46 = vadd.f32 %v3035_v43, %v2976_v41  ;;  %v3038_v47 = vadd.f32 %v3037_v45, %v3036_v44 }
 0x3e3   :  { %v2358_v48 = vadd.f32 %v3038_v47, %v2976_v41  ;;  %v2361_v49 = vmax.f32 %v2355_v46, 0.0 }
 0x3e5   :  { %v2362_v50 = vmax.f32 %v2358_v48, 0.0 }
 0x3e7   :  { %v2363_v52 = vpack.c.bf16 %v2362_v50, %v2361_v49 }
 0x3e9   :  { %3079 = vmatmul.mubr.bf16.vlgmr.msra.gmra.mrb[12].mxu1 %v2363_v52 }
 0x3ea   :  { %3083 = vmatpush3.bf16.msra.mxu1 %v3589_v51  ;;  %3098 = vmatprep.mubr.msk.bf16.mxu1 %vm3714_vm1, %v3713_v18 }
 0x3eb   :  { %3084 = vmatprep.subr.bf16.mxu1 %v3713_v18 }
 0x3ee   :  { %3085 = vmatpush3.bf16.msra.mxu1 %v3590_v53 }
 0x3ef   :  { %3086 = vmatprep.subr.bf16.mxu1 %v3713_v18 }
 0x3f2   :  { %3087 = vmatpush3.bf16.msra.mxu1 %v3591_v54 }
 0x3f3   :  { %3088 = vmatprep.subr.bf16.mxu1 %v3713_v18 }
 0x3f6   :  { %3089 = vmatpush3.bf16.msra.mxu1 %v3592_v55 }
 0x3f7   :  { %3090 = vmatprep.subr.bf16.mxu1 %v3713_v18 }
 0x3fa   :  { %3091 = vmatpush3.bf16.msra.mxu1 %v3593_v56 }
 0x3fb   :  { %3092 = vmatprep.subr.bf16.mxu1 %v3713_v18 }
 0x3fe   :  { %3093 = vmatpush3.bf16.msra.mxu1 %v3594_v57 }
 0x3ff   :  { %3094 = vmatprep.subr.bf16.mxu1 %v3713_v18 }
 0x402   :  { %3095 = vmatpush3.bf16.msra.mxu1 %v3595_v58 }
 0x403   :  { %3096 = vmatprep.subr.bf16.mxu1 %v3713_v18 }
 0x406   :  { %3097 = vmatpush3.bf16.msra.mxu1 %v3596_v59 }
 0x407   :  { %3102 = vmatprep.subr.bf16.mxu1 %v3713_v18 }
 0x4bc   :  { %v2469_v61 = vpop.f32.mrb[12].mxu1 }
 0x4bd   :  { %v2470_v62 = vadd.f32 %v2993_v60, %v2469_v61  ;;  %v3080_v63 = vpop.f32.mrb[13].mxu1 }
 0x4be   :  { %v2472_v3 = vpop.f32.mrb[14].mxu1 }
 0x4bf   :  { %v2473_v5 = vadd.f32 %v2993_v60, %v2472_v3  ;;  %v3081_v6 = vpop.f32.mrb[15].mxu1  ;;  %v2476_v7 = vmax.f32 %v2470_v62, 0.0 }
 0x4c1   :  { %v2477_v8 = vmax.f32 %v2473_v5, 0.0 }
 0x4c3   :  { %v2478_v10 = vpack.c.bf16 %v2477_v8, %v2476_v7 }
 0x4c5   :  { %3099 = vmatmul.mubr.bf16.vlgmr.msra.gmra.mrb[16].mxu1 %v2478_v10 }
 0x4c6   :  { %3103 = vmatpush3.bf16.msra.mxu1 %v3597_v9  ;;  %3110 = vmatprep.mubr.msk.bf16.mxu1 %vm3714_vm1, %v3713_v18 }
 0x4c7   :  { %3104 = vmatprep.subr.bf16.mxu1 %v3713_v18 }
 0x4ca   :  { %3105 = vmatpush3.bf16.msra.mxu1 %v3598_v11 }
 0x4cb   :  { %3106 = vmatprep.subr.bf16.mxu1 %v3713_v18 }
 0x4ce   :  { %3107 = vmatpush3.bf16.msra.mxu1 %v3599_v12 }
 0x4cf   :  { %3108 = vmatprep.subr.bf16.mxu1 %v3713_v18 }
 0x4d2   :  { %3109 = vmatpush3.bf16.msra.mxu1 %v3600_v13 }
 0x598   :  { %v2584_v15 = vpop.f32.mrb[16].mxu1 }
 0x599   :  { %v2585_v16 = vadd.f32 %v3002_v14, %v2584_v15  ;;  %v3100_v17 = vpop.f32.mrb[17].mxu1 }
 0x59a   :  { %v2587_v19 = vpop.f32.mrb[18].mxu1 }
 0x59b   :  { %v2588_v20 = vadd.f32 %v3002_v14, %v2587_v19  ;;  %v3101_v21 = vpop.f32.mrb[19].mxu1  ;;  %v2591_v22 = vmax.f32 %v2585_v16, 0.0 }
 0x59d   :  { %v2592_v23 = vmax.f32 %v2588_v20, 0.0 }
 0x59f   :  { %v2593_v0 = vpack.c.bf16 %v2592_v23, %v2591_v22 }
 0x5a1   :  { %3111 = vmatmul.mubr.msk.bf16.vlgmr.msra.gmra.mrb[20].mxu1 %vm2633_vm2, %v2593_v0 }
 0x674   :  { %v2671_v25 = vpop.f32.mrb[20].mxu1 }
 0x675   :  { %v2672_v18 = vadd.f32 %v3011_v24, %v2671_v25  ;;  %v3112_v26 = vpop.f32.mrb[21].mxu1 }
 0x676   :  { %v2674_v27 = vpop.f32.mrb[22].mxu1 }
 0x677   :  { %2678 = vmax.xlane.f32.xlu0 %v2672_v18  ;;  %v3113_v28 = vpop.f32.mrb[23].mxu1  ;;  %v2675_v29 = vadd.f32 %v3011_v24, %v2674_v27 }
 0x67b   :  { %2680 = vmax.xlane.f32.xlu0 %v2675_v29 }
 0x704   :  { %v2679_v30 = vpop.xlane.xlu0 %2678 }
 0x705   :  { %v2682_v31 = vsub.f32 %v2672_v18, %v2679_v30 }
 0x707   :  { %v2684_v32 = vmul.f32 1.442695, %v2682_v31 }
 0x708   :  { %v2681_v33 = vpop.xlane.xlu0 %2680 }
 0x709   :  { %v2683_v34 = vsub.f32 %v2675_v29, %v2681_v33  ;;  %3601 = vpow2.f32 %v2684_v32 }
 0x70b   :  { %v2686_v2 = vmul.f32 1.442695, %v2683_v34 }
 0x70d   :  { %3603 = vpow2.f32 %v2686_v2 }
 0x713   :  { %v3602_v1 = vpop.eup %3601 }
 0x714   :  { %2688 = vadd.xlane.f32.xlu1 %v3602_v1 }
 0x717   :  { %v3604_v4 = vpop.eup %3603 }
 0x718   :  { %2690 = vadd.xlane.f32.xlu1 %v3604_v4 }
 0x7a1   :  { %v2689_v35 = vpop.xlane.xlu1 %2688 }
 0x7a2   :  { %3605 = vlog2.f32 %v2689_v35 }
 0x7a5   :  { %v2691_v36 = vpop.xlane.xlu1 %2690 }
 0x7a6   :  { %3607 = vlog2.f32 %v2691_v36 }
 0x7ac   :  { %v3606_v37 = vpop.eup %3605 }
 0x7ad   :  { %v2693_v38 = vmul.f32 0.6931472, %v3606_v37 }
 0x7af   :  { %v2696_v39 = vsub.f32 %v2682_v31, %v2693_v38 }
 0x7b0   :  { %v3608_v40 = vpop.eup %3607 }
 0x7b1   :  { %2698 = vst [vmem:[%s4246_s13] sm:$0xff] %v2696_v39  ;;  %v2695_v41 = vmul.f32 0.6931472, %v3608_v40 }
 0x7b3   :  { %v2697_v42 = vsub.f32 %v2683_v34, %v2695_v41 }
 0x7b5   :  { %2699 = vst [vmem:[%s4246_s13 + $0x8] sm:$0xff] %v2697_v42 }
 0x7b6   :  { %2704 = vsyncpa [#allocation3], 1 }
 0x7b7   :  { %2705 = vsyncpa [#allocation5], 1 }
 0x7b8   :  { %2706 = vsyncpa [#allocation8], 1 }

</bundles_post_ra>
